<compile_context>
chip_gen: v7x
topology: tpu7x:2x2x1
jax: 0.10.0
libtpu: 0.0.40
codegen_flags: <defaults>
</compile_context>

<pallas_src>
import functools
import math

import jax
import jax.numpy as jnp
from jax import lax
from jax.experimental import pallas as pl
from jax.experimental.pallas import tpu as pltpu

# ----------------------------- configuration --------------------------------
BATCH = 2
IN_C = 16          # in_channels
OUT_C = 16         # out_channels (== IN_C -> identity shortcuts)
INTER_C = 8        # inter_channels
NUM_SUBSET = 3
NUM_NODE = 8       # V
NUM_FRAME = 8      # T


# ------------------------------- Pallas kernel ------------------------------
def st_attention_kernel(
    x_ref,          # (N*V, C*T)      f32  rows (n,v), lanes (c,t)
    pes_ref,        # (N*V, C*T)      f32  spatial positional encoding (tiled)
    pet_ref,        # (N*T, Co*V)     f32  temporal positional encoding (tiled)
    w_in_s_ref,     # (C*T, 2*S*Ci*T) bf16
    b_in_s_ref,     # (1, 2*S*Ci*T)   f32
    att0s_ref,      # (N*V, S*N*V)    f32  block-diag(att0s[s]^T), s along lanes
    amask_s_ref,    # (N*V, S*N*V)    f32  alpha_s * block mask
    w_out_s_ref,    # (C*T, S*Co*T)   bf16
    b_out_s_ref,    # (1, Co*T)       f32
    w_ff_s_ref,     # (Co*T, Co*T)    bf16
    b_ff_s_ref,     # (1, Co*T)       f32
    w_in_t_ref,     # (Co*V, 2*S*Ci*V) bf16
    b_in_t_ref,     # (1, 2*S*Ci*V)   f32
    att0t_ref,      # (N*T, S*N*T)    f32
    amask_t_ref,    # (N*T, S*N*T)    f32
    w_out_t_ref,    # (Co*V, S*Co*V)  bf16
    b_out_t_ref,    # (1, Co*V)       f32
    w_ff_t_ref,     # (Co*V, Co*V)    bf16
    b_ff_t_ref,     # (1, Co*V)       f32
    o_ref,          # (N*T, Co*V)     f32  rows (n,t), lanes (c,v)
    *,
    num_subset, num_node, num_frame,
):
    S, V, T = num_subset, num_node, num_frame
    Rs = x_ref.shape[0]            # N*V  (rows of the spatial half)
    Rt = o_ref.shape[0]            # N*T  (rows of the temporal half)
    NB = Rs // V                   # batch folded onto sublanes
    CiT = w_in_s_ref.shape[1] // (2 * S)
    CoT = b_out_s_ref.shape[1]
    CiV = w_in_t_ref.shape[1] // (2 * S)
    CoV = b_out_t_ref.shape[1]
    Co = CoT // T
    f32 = jnp.float32

    def lrelu(v):                  # nn.LeakyReLU(0.1)
        return jnp.where(v > 0, v, 0.1 * v)

    def mm(a, b):                  # A @ B, f32 accumulation on the MXU
        return jnp.dot(a, b, preferred_element_type=f32)

    def mm_nt(a, b):               # A @ B^T (contract the lane axis of both)
        return lax.dot_general(a, b, (((1,), (1,)), ((), ())),
                               preferred_element_type=f32)

    def attention_half(inp, pe, w_in, b_in, att0bd, amask, w_out, b_out,
                       w_ff, b_ff, R, CiK, CoK):
        # inp rows carry (sample, position); lanes carry (channel, other pos).
        # 1/(Ci*T) resp. 1/(Ci*V) score norm is folded into the q-half of w_in.
        qk = mm(inp + pe, w_in) + b_in                       # (R, 2*S*CiK)
        xw = mm(inp, w_out)                                  # (R, S*CoK), commuted out-conv
        # Transposed scores for all subsets (k @ q^T), full batch at once; the
        # off-diagonal cross-sample blocks are garbage and are zeroed exactly
        # by amask below.  One concatenate -> single tanh/VPU pass.
        scT = jnp.concatenate(
            [mm_nt(qk[:, (S + s) * CiK:(S + s + 1) * CiK],
                   qk[:, s * CiK:(s + 1) * CiK]) for s in range(S)],
            axis=1)                                          # (R, S*R)
        attT = jnp.tanh(scT) * amask + att0bd                # (R, S*R)
        acc = b_out                                          # (1, CoK)
        for s in range(S):
            acc = acc + mm(attT[:, s * R:(s + 1) * R],
                           xw[:, s * CoK:(s + 1) * CoK])     # (R, CoK)
        h = lrelu(inp + acc)                                 # identity shortcut
        h = mm(h, w_ff) + b_ff
        return lrelu(inp + h)                                # identity shortcut

    x = x_ref[...]

    # ------------------------- spatial attention ----------------------------
    y4 = attention_half(
        x, pes_ref[...],
        w_in_s_ref[...].astype(f32), b_in_s_ref[...],
        att0s_ref[...], amask_s_ref[...],
        w_out_s_ref[...].astype(f32), b_out_s_ref[...],
        w_ff_s_ref[...].astype(f32), b_ff_s_ref[...],
        Rs, CiT, CoT)

    # --------- layout switch: rows (n,v)/lanes (c,t) -> rows (n,t)/lanes (c,v)
    # One batched minor-dim transpose per channel (Mosaic only supports
    # swapping the two minormost dims, so a fused 4-D transpose is avoided).
    parts = []
    for c in range(Co):
        blk = y4[:, c * T:(c + 1) * T].reshape(NB, V, T)
        parts.append(jnp.swapaxes(blk, 1, 2).reshape(NB * T, V))
    y4_t = jnp.concatenate(parts, axis=1)                    # (N*T, Co*V)

    # ------------------------- temporal attention ---------------------------
    o_ref[...] = attention_half(
        y4_t, pet_ref[...],
        w_in_t_ref[...].astype(f32), b_in_t_ref[...],
        att0t_ref[...], amask_t_ref[...],
        w_out_t_ref[...].astype(f32), b_out_t_ref[...],
        w_ff_t_ref[...].astype(f32), b_ff_t_ref[...],
        Rt, CiV, CoV)


# ------------------------------ wrapper (glue) -------------------------------
def st_attention_block(x, kp):
    """x: (N, C, T, V) NCHW; kp: params from to_kernel_params."""
    N, C, T, V = x.shape
    Co = kp['b_out_t'].shape[1] // V
    assert C == Co, "identity shortcuts require in_channels == out_channels"

    # NCHW -> lane-dense spatial layout: rows (n*V + v), lanes (c*T + t).
    x2 = jnp.transpose(x, (0, 3, 1, 2)).reshape(N * V, C * T)

    operands = [
        x2, kp['pes'], kp['pet'],
        kp['w_in_s'], kp['b_in_s'], kp['att0s_bd'], kp['amask_s'],
        kp['w_out_s'], kp['b_out_s'], kp['w_ff_s'], kp['b_ff_s'],
        kp['w_in_t'], kp['b_in_t'], kp['att0t_bd'], kp['amask_t'],
        kp['w_out_t'], kp['b_out_t'], kp['w_ff_t'], kp['b_ff_t'],
    ]

    def full_spec(a):
        nd = a.ndim
        return pl.BlockSpec(a.shape, lambda i, _nd=nd: (0,) * _nd)

    kernel = functools.partial(
        st_attention_kernel,
        num_subset=NUM_SUBSET, num_node=V, num_frame=T)

    # Single grid step: the whole (small) batch is stacked on sublanes, so the
    # weights are fetched exactly once and there is no per-step pipeline
    # overhead and no per-core weight duplication.  For large N, tile the batch
    # into sub-blocks per grid step instead.
    out2 = pl.pallas_call(
        kernel,
        out_shape=jax.ShapeDtypeStruct((N * T, Co * V), jnp.float32),
        grid=(1,),
        in_specs=[full_spec(a) for a in operands],
        out_specs=pl.BlockSpec((N * T, Co * V), lambda i: (0, 0)),
    )(*operands)

    # lane-dense temporal layout rows (n*T + t), lanes (c*V + v) -> NCHW.
    return out2.reshape(N, T, Co, V).transpose(0, 2, 1, 3)


# --------------------------- parameter construction --------------------------
def positional_encoding(channel, joint_num, time_len, domain):
    if domain == 'temporal':
        pos = jnp.repeat(jnp.arange(time_len), joint_num)
    else:  # spatial
        pos = jnp.tile(jnp.arange(joint_num), time_len)
    pos = pos.astype(jnp.float32)[:, None]
    div = jnp.exp(jnp.arange(0, channel, 2).astype(jnp.float32)
                  * -(math.log(10000.0) / channel))
    pe = jnp.zeros((time_len * joint_num, channel), jnp.float32)
    pe = pe.at[:, 0::2].set(jnp.sin(pos * div))
    pe = pe.at[:, 1::2].set(jnp.cos(pos * div))
    pe = pe.reshape(time_len, joint_num, channel).transpose(2, 0, 1)  # (C, T, V)
    return pe


def bn_params(key, c):
    k1, k2, k3, k4 = jax.random.split(key, 4)
    gamma = (1.0 + 0.1 * jax.random.normal(k1, (c,))).astype(jnp.float32)
    beta = (0.1 * jax.random.normal(k2, (c,))).astype(jnp.float32)
    mean = (0.1 * jax.random.normal(k3, (c,))).astype(jnp.float32)
    var = (1.0 + 0.2 * jax.random.uniform(k4, (c,))).astype(jnp.float32)
    return gamma, beta, mean, var


def fold_bn(w, b, gamma, beta, mean, var, eps=1e-5):
    scale = gamma / jnp.sqrt(var + eps)
    return w * scale[:, None], (b - mean) * scale + beta


def bf16_round(w):
    # Master weights are kept at bf16-representable f32 values so the kernel's
    # bf16 weight storage is a *lossless* compression of what the reference
    # computes with (the kernel upcasts back to the identical f32 values).
    return w.astype(jnp.bfloat16).astype(jnp.float32)


def init_params(key):
    S, C, Co, Ci, T, V = NUM_SUBSET, IN_C, OUT_C, INTER_C, NUM_FRAME, NUM_NODE
    ks = jax.random.split(key, 16)
    nrm = lambda k, shape, s=0.1: (s * jax.random.normal(k, shape)).astype(jnp.float32)

    p = {}
    p['pes'] = positional_encoding(C, V, T, 'spatial')              # (C, T, V)
    p['pet'] = positional_encoding(Co, V, T, 'temporal')            # (Co, T, V)

    # spatial branch
    p['w_in_s'] = bf16_round(nrm(ks[0], (2 * S * Ci, C)))
    p['b_in_s'] = nrm(ks[1], (2 * S * Ci,))
    p['alphas'] = jnp.ones((S, 1), jnp.float32)
    p['att0s'] = jnp.ones((S, V, V), jnp.float32) / V
    w, b = fold_bn(nrm(ks[2], (Co, S * C)), nrm(ks[3], (Co,)), *bn_params(ks[4], Co))
    p['w_out_s'], p['b_out_s'] = bf16_round(w), b
    w, b = fold_bn(nrm(ks[5], (Co, Co)), nrm(ks[6], (Co,)), *bn_params(ks[7], Co))
    p['w_ff_s'], p['b_ff_s'] = bf16_round(w), b

    # temporal branch
    p['w_in_t'] = bf16_round(nrm(ks[8], (2 * S * Ci, Co)))
    p['b_in_t'] = nrm(ks[9], (2 * S * Ci,))
    p['alphat'] = jnp.ones((S, 1), jnp.float32)
    p['att0t'] = jnp.broadcast_to(jnp.eye(T, dtype=jnp.float32), (S, T, T))
    w, b = fold_bn(nrm(ks[10], (Co, S * Co)), nrm(ks[11], (Co,)), *bn_params(ks[12], Co))
    p['w_out_t'], p['b_out_t'] = bf16_round(w), b
    w, b = fold_bn(nrm(ks[13], (Co, Co)), nrm(ks[14], (Co,)), *bn_params(ks[15], Co))
    p['w_ff_t'], p['b_ff_t'] = bf16_round(w), b
    return p


def to_kernel_params(p, batch):
    """Pre-arrange parameters for the batch-stacked lane-dense kernel layouts."""
    S, C, Co, Ci, T, V = NUM_SUBSET, IN_C, OUT_C, INTER_C, NUM_FRAME, NUM_NODE
    N = batch
    I_T = jnp.eye(T, dtype=jnp.float32)
    I_V = jnp.eye(V, dtype=jnp.float32)

    def kron_in(w, b, eye, scale):
        # Fold the attention normalisation into the q-half (first S*Ci rows);
        # 1/scale is a power of two here, so bf16 storage stays exact.
        sc = jnp.concatenate([jnp.full((S * Ci,), 1.0 / scale, jnp.float32),
                              jnp.ones((S * Ci,), jnp.float32)])
        w = w * sc[:, None]
        b = b * sc
        return jnp.kron(w.T, eye), jnp.repeat(b, eye.shape[0])[None, :]

    def kron_grouped(w, b, groups, eye):
        cin = w.shape[1] // groups
        w3 = w.reshape(w.shape[0], groups, cin)
        wk = jnp.concatenate(
            [jnp.kron(w3[:, s, :].T, eye) for s in range(groups)], axis=1)
        return wk, jnp.repeat(b, eye.shape[0])[None, :]

    def attn_consts(att0, alpha, nb):
        # Block-diagonal att0^T over the batch and alpha_s * block-mask, with
        # the S subset blocks concatenated along lanes: both (nb*K, S*nb*K).
        S_, K, _ = att0.shape
        eyeN = jnp.eye(nb, dtype=jnp.float32)
        bd = jnp.einsum('nm,sji->snimj', eyeN, att0).reshape(S_, nb * K, nb * K)
        mask = jnp.kron(eyeN, jnp.ones((K, K), jnp.float32))
        att0_cat = jnp.concatenate([bd[s] for s in range(S_)], axis=1)
        amask_cat = jnp.concatenate([alpha[s] * mask for s in range(S_)], axis=1)
        return att0_cat, amask_cat

    w_in_s, b_in_s = kron_in(p['w_in_s'], p['b_in_s'], I_T, Ci * T)
    w_out_s, b_out_s = kron_grouped(p['w_out_s'], p['b_out_s'], S, I_T)
    w_ff_s, b_ff_s = kron_grouped(p['w_ff_s'], p['b_ff_s'], 1, I_T)
    w_in_t, b_in_t = kron_in(p['w_in_t'], p['b_in_t'], I_V, Ci * V)
    w_out_t, b_out_t = kron_grouped(p['w_out_t'], p['b_out_t'], S, I_V)
    w_ff_t, b_ff_t = kron_grouped(p['w_ff_t'], p['b_ff_t'], 1, I_V)

    att0s_bd, amask_s = attn_consts(p['att0s'], p['alphas'].reshape(S), N)
    att0t_bd, amask_t = attn_consts(p['att0t'], p['alphat'].reshape(S), N)

    bf16 = lambda w: w.astype(jnp.bfloat16)   # lossless: values already bf16-representable

    pes_rows = p['pes'].transpose(2, 0, 1).reshape(V, C * T)    # (V, C*T)
    pet_rows = p['pet'].transpose(1, 0, 2).reshape(T, Co * V)   # (T, Co*V)

    return {
        'pes': jnp.tile(pes_rows, (N, 1)),           # (N*V, C*T)
        'pet': jnp.tile(pet_rows, (N, 1)),           # (N*T, Co*V)
        'w_in_s': bf16(w_in_s), 'b_in_s': b_in_s,
        'att0s_bd': att0s_bd, 'amask_s': amask_s,
        'w_out_s': bf16(w_out_s), 'b_out_s': b_out_s,
        'w_ff_s': bf16(w_ff_s), 'b_ff_s': b_ff_s,
        'w_in_t': bf16(w_in_t), 'b_in_t': b_in_t,
        'att0t_bd': att0t_bd, 'amask_t': amask_t,
        'w_out_t': bf16(w_out_t), 'b_out_t': b_out_t,
        'w_ff_t': bf16(w_ff_t), 'b_ff_t': b_ff_t,
    }


# ------------------------ pure-JAX reference (checking) ----------------------
def reference_forward(x, p):
    N, C, T, V = x.shape
    S, Ci, Co = NUM_SUBSET, INTER_C, OUT_C
    lrelu = lambda v: jnp.where(v > 0, v, 0.1 * v)

    def conv1x1(w, b, inp):
        return jnp.einsum('oi,nitv->notv', w, inp) + b[None, :, None, None]

    # spatial
    y = x + p['pes'][None]
    qk = conv1x1(p['w_in_s'], p['b_in_s'], y).reshape(N, 2 * S, Ci, T, V)
    q, k = qk[:, :S], qk[:, S:]
    att = jnp.tanh(jnp.einsum('nsctu,nsctv->nsuv', q, k) / (Ci * T)) \
        * p['alphas'].reshape(1, S, 1, 1)
    att = att + p['att0s'][None]
    ys = jnp.einsum('nctu,nsuv->nsctv', x, att).reshape(N, S * C, T, V)
    y1 = conv1x1(p['w_out_s'], p['b_out_s'], ys)
    y2 = lrelu(x + y1)
    y3 = conv1x1(p['w_ff_s'], p['b_ff_s'], y2)
    y4 = lrelu(x + y3)

    # temporal
    z = y4 + p['pet'][None]
    qk = conv1x1(p['w_in_t'], p['b_in_t'], z).reshape(N, 2 * S, Ci, T, V)
    q, k = qk[:, :S], qk[:, S:]
    att = jnp.tanh(jnp.einsum('nsctv,nscqv->nstq', q, k) / (Ci * V)) \
        * p['alphat'].reshape(1, S, 1, 1)
    att = att + p['att0t'][None]
    zs = jnp.einsum('nctv,nstq->nscqv', y4, att).reshape(N, S * Co, T, V)
    z1 = conv1x1(p['w_out_t'], p['b_out_t'], zs)
    z2 = lrelu(y4 + z1)
    z3 = conv1x1(p['w_ff_t'], p['b_ff_t'], z2)
    z4 = lrelu(y4 + z3)
    return z4


# ----------------------------------- main ------------------------------------
if __name__ == "__main__":
    key = jax.random.PRNGKey(0)
    kx, kparam = jax.random.split(key)

    x = jax.random.normal(kx, (BATCH, IN_C, NUM_FRAME, NUM_NODE), jnp.float32)
    params = init_params(kparam)
    kparams = to_kernel_params(params, BATCH)

    out = jax.block_until_ready(jax.jit(st_attention_block)(x, kparams))

    with jax.default_matmul_precision("highest"):
        ref = jax.block_until_ready(reference_forward(x, params))

    assert out.shape == (BATCH, OUT_C, NUM_FRAME, NUM_NODE), out.shape
    max_err = float(jnp.max(jnp.abs(out - ref)))
    # all-f32 compute path; bf16 weight storage is lossless (weights are
    # bf16-representable), so the tight tolerance is preserved.
    assert max_err < 1e-3, f"max abs err = {max_err}"

    print("KERNEL_OK")
</pallas_src>

<mosaic_0001>
module attributes {stable_mosaic.version = 11 : i64} {
  func.func @st_attention_kernel(%arg0: i32, %arg1: memref<16x128xf32, #tpu.memory_space<vmem>>, %arg2: memref<16x128xf32, #tpu.memory_space<vmem>>, %arg3: memref<16x128xf32, #tpu.memory_space<vmem>>, %arg4: memref<128x384xbf16, #tpu.memory_space<vmem>>, %arg5: memref<1x384xf32, #tpu.memory_space<vmem>>, %arg6: memref<16x48xf32, #tpu.memory_space<vmem>>, %arg7: memref<16x48xf32, #tpu.memory_space<vmem>>, %arg8: memref<128x384xbf16, #tpu.memory_space<vmem>>, %arg9: memref<1x128xf32, #tpu.memory_space<vmem>>, %arg10: memref<128x128xbf16, #tpu.memory_space<vmem>>, %arg11: memref<1x128xf32, #tpu.memory_space<vmem>>, %arg12: memref<128x384xbf16, #tpu.memory_space<vmem>>, %arg13: memref<1x384xf32, #tpu.memory_space<vmem>>, %arg14: memref<16x48xf32, #tpu.memory_space<vmem>>, %arg15: memref<16x48xf32, #tpu.memory_space<vmem>>, %arg16: memref<128x384xbf16, #tpu.memory_space<vmem>>, %arg17: memref<1x128xf32, #tpu.memory_space<vmem>>, %arg18: memref<128x128xbf16, #tpu.memory_space<vmem>>, %arg19: memref<1x128xf32, #tpu.memory_space<vmem>>, %arg20: memref<16x128xf32, #tpu.memory_space<vmem>>) attributes {dimension_semantics = [#tpu.dimension_semantics<arbitrary>], iteration_bounds = array<i64: 1>, scalar_prefetch = 0 : i64, scratch_operands = 0 : i64, tpu.core_type = #tpu.core_type<tc>, window_params = [{pipeline_mode = #tpu.pipeline_mode<synchronous>, transform_indices = @transform_0, window_bounds = array<i64: 16, 128>}, {pipeline_mode = #tpu.pipeline_mode<synchronous>, transform_indices = @transform_1, window_bounds = array<i64: 16, 128>}, {pipeline_mode = #tpu.pipeline_mode<synchronous>, transform_indices = @transform_2, window_bounds = array<i64: 16, 128>}, {pipeline_mode = #tpu.pipeline_mode<synchronous>, transform_indices = @transform_3, window_bounds = array<i64: 128, 384>}, {pipeline_mode = #tpu.pipeline_mode<synchronous>, transform_indices = @transform_4, window_bounds = array<i64: 1, 384>}, {pipeline_mode = #tpu.pipeline_mode<synchronous>, transform_indices = @transform_5, window_bounds = array<i64: 16, 48>}, {pipeline_mode = #tpu.pipeline_mode<synchronous>, transform_indices = @transform_6, window_bounds = array<i64: 16, 48>}, {pipeline_mode = #tpu.pipeline_mode<synchronous>, transform_indices = @transform_7, window_bounds = array<i64: 128, 384>}, {pipeline_mode = #tpu.pipeline_mode<synchronous>, transform_indices = @transform_8, window_bounds = array<i64: 1, 128>}, {pipeline_mode = #tpu.pipeline_mode<synchronous>, transform_indices = @transform_9, window_bounds = array<i64: 128, 128>}, {pipeline_mode = #tpu.pipeline_mode<synchronous>, transform_indices = @transform_10, window_bounds = array<i64: 1, 128>}, {pipeline_mode = #tpu.pipeline_mode<synchronous>, transform_indices = @transform_11, window_bounds = array<i64: 128, 384>}, {pipeline_mode = #tpu.pipeline_mode<synchronous>, transform_indices = @transform_12, window_bounds = array<i64: 1, 384>}, {pipeline_mode = #tpu.pipeline_mode<synchronous>, transform_indices = @transform_13, window_bounds = array<i64: 16, 48>}, {pipeline_mode = #tpu.pipeline_mode<synchronous>, transform_indices = @transform_14, window_bounds = array<i64: 16, 48>}, {pipeline_mode = #tpu.pipeline_mode<synchronous>, transform_indices = @transform_15, window_bounds = array<i64: 128, 384>}, {pipeline_mode = #tpu.pipeline_mode<synchronous>, transform_indices = @transform_16, window_bounds = array<i64: 1, 128>}, {pipeline_mode = #tpu.pipeline_mode<synchronous>, transform_indices = @transform_17, window_bounds = array<i64: 128, 128>}, {pipeline_mode = #tpu.pipeline_mode<synchronous>, transform_indices = @transform_18, window_bounds = array<i64: 1, 128>}, {pipeline_mode = #tpu.pipeline_mode<synchronous>, transform_indices = @transform_19, window_bounds = array<i64: 16, 128>}]} {
    %c0 = arith.constant 0 : index
    %c0_0 = arith.constant 0 : index
    %0 = vector.load %arg1[%c0, %c0_0] : memref<16x128xf32, #tpu.memory_space<vmem>>, vector<16x128xf32>
    %c0_1 = arith.constant 0 : index
    %c0_2 = arith.constant 0 : index
    %1 = vector.load %arg2[%c0_1, %c0_2] : memref<16x128xf32, #tpu.memory_space<vmem>>, vector<16x128xf32>
    %c0_3 = arith.constant 0 : index
    %c0_4 = arith.constant 0 : index
    %2 = vector.load %arg4[%c0_3, %c0_4] : memref<128x384xbf16, #tpu.memory_space<vmem>>, vector<128x384xbf16>
    %3 = arith.extf %2 : vector<128x384xbf16> to vector<128x384xf32>
    %c0_5 = arith.constant 0 : index
    %c0_6 = arith.constant 0 : index
    %4 = vector.load %arg5[%c0_5, %c0_6] : memref<1x384xf32, #tpu.memory_space<vmem>>, vector<1x384xf32>
    %c0_7 = arith.constant 0 : index
    %c0_8 = arith.constant 0 : index
    %5 = vector.load %arg6[%c0_7, %c0_8] : memref<16x48xf32, #tpu.memory_space<vmem>>, vector<16x48xf32>
    %c0_9 = arith.constant 0 : index
    %c0_10 = arith.constant 0 : index
    %6 = vector.load %arg7[%c0_9, %c0_10] : memref<16x48xf32, #tpu.memory_space<vmem>>, vector<16x48xf32>
    %c0_11 = arith.constant 0 : index
    %c0_12 = arith.constant 0 : index
    %7 = vector.load %arg8[%c0_11, %c0_12] : memref<128x384xbf16, #tpu.memory_space<vmem>>, vector<128x384xbf16>
    %8 = arith.extf %7 : vector<128x384xbf16> to vector<128x384xf32>
    %c0_13 = arith.constant 0 : index
    %c0_14 = arith.constant 0 : index
    %9 = vector.load %arg9[%c0_13, %c0_14] : memref<1x128xf32, #tpu.memory_space<vmem>>, vector<1x128xf32>
    %c0_15 = arith.constant 0 : index
    %c0_16 = arith.constant 0 : index
    %10 = vector.load %arg10[%c0_15, %c0_16] : memref<128x128xbf16, #tpu.memory_space<vmem>>, vector<128x128xbf16>
    %11 = arith.extf %10 : vector<128x128xbf16> to vector<128x128xf32>
    %c0_17 = arith.constant 0 : index
    %c0_18 = arith.constant 0 : index
    %12 = vector.load %arg11[%c0_17, %c0_18] : memref<1x128xf32, #tpu.memory_space<vmem>>, vector<1x128xf32>
    %13 = arith.addf %0, %1 : vector<16x128xf32>
    %cst = arith.constant dense<0.000000e+00> : vector<16x384xf32>
    %14 = tpu.matmul %13, %3, %cst {dimension_numbers = #tpu.dot_dimension_numbers<[1], [0], [0], [1], [0, 0, 1, 1], [], []>} : vector<16x128xf32>, vector<128x384xf32>, vector<16x384xf32> -> vector<16x384xf32>
    %15 = vector.broadcast %4 : vector<1x384xf32> to vector<16x384xf32>
    %16 = arith.addf %14, %15 : vector<16x384xf32>
    %cst_19 = arith.constant dense<0.000000e+00> : vector<16x384xf32>
    %17 = tpu.matmul %0, %8, %cst_19 {dimension_numbers = #tpu.dot_dimension_numbers<[1], [0], [0], [1], [0, 0, 1, 1], [], []>} : vector<16x128xf32>, vector<128x384xf32>, vector<16x384xf32> -> vector<16x384xf32>
    %18 = vector.extract_strided_slice %16 {offsets = [0, 192], sizes = [16, 64], strides = [1, 1]} : vector<16x384xf32> to vector<16x64xf32>
    %19 = vector.extract_strided_slice %16 {offsets = [0, 0], sizes = [16, 64], strides = [1, 1]} : vector<16x384xf32> to vector<16x64xf32>
    %cst_20 = arith.constant dense<0.000000e+00> : vector<16x16xf32>
    %20 = tpu.matmul %18, %19, %cst_20 {dimension_numbers = #tpu.dot_dimension_numbers<[1], [1], [0], [0], [0, 0, 1, 0], [], []>} : vector<16x64xf32>, vector<16x64xf32>, vector<16x16xf32> -> vector<16x16xf32>
    %21 = vector.extract_strided_slice %16 {offsets = [0, 256], sizes = [16, 64], strides = [1, 1]} : vector<16x384xf32> to vector<16x64xf32>
    %22 = vector.extract_strided_slice %16 {offsets = [0, 64], sizes = [16, 64], strides = [1, 1]} : vector<16x384xf32> to vector<16x64xf32>
    %cst_21 = arith.constant dense<0.000000e+00> : vector<16x16xf32>
    %23 = tpu.matmul %21, %22, %cst_21 {dimension_numbers = #tpu.dot_dimension_numbers<[1], [1], [0], [0], [0, 0, 1, 0], [], []>} : vector<16x64xf32>, vector<16x64xf32>, vector<16x16xf32> -> vector<16x16xf32>
    %24 = vector.extract_strided_slice %16 {offsets = [0, 320], sizes = [16, 64], strides = [1, 1]} : vector<16x384xf32> to vector<16x64xf32>
    %25 = vector.extract_strided_slice %16 {offsets = [0, 128], sizes = [16, 64], strides = [1, 1]} : vector<16x384xf32> to vector<16x64xf32>
    %cst_22 = arith.constant dense<0.000000e+00> : vector<16x16xf32>
    %26 = tpu.matmul %24, %25, %cst_22 {dimension_numbers = #tpu.dot_dimension_numbers<[1], [1], [0], [0], [0, 0, 1, 0], [], []>} : vector<16x64xf32>, vector<16x64xf32>, vector<16x16xf32> -> vector<16x16xf32>
    %27 = tpu.concatenate %20, %23, %26 in 1 : vector<16x16xf32>, vector<16x16xf32>, vector<16x16xf32> -> vector<16x48xf32>
    %28 = math.tanh %27 : vector<16x48xf32>
    %29 = arith.mulf %28, %6 : vector<16x48xf32>
    %30 = arith.addf %29, %5 : vector<16x48xf32>
    %31 = vector.extract_strided_slice %30 {offsets = [0, 0], sizes = [16, 16], strides = [1, 1]} : vector<16x48xf32> to vector<16x16xf32>
    %32 = vector.extract_strided_slice %17 {offsets = [0, 0], sizes = [16, 128], strides = [1, 1]} : vector<16x384xf32> to vector<16x128xf32>
    %cst_23 = arith.constant dense<0.000000e+00> : vector<16x128xf32>
    %33 = tpu.matmul %31, %32, %cst_23 {dimension_numbers = #tpu.dot_dimension_numbers<[1], [0], [0], [1], [0, 0, 1, 1], [], []>} : vector<16x16xf32>, vector<16x128xf32>, vector<16x128xf32> -> vector<16x128xf32>
    %34 = vector.broadcast %9 : vector<1x128xf32> to vector<16x128xf32>
    %35 = arith.addf %34, %33 : vector<16x128xf32>
    %36 = vector.extract_strided_slice %30 {offsets = [0, 16], sizes = [16, 16], strides = [1, 1]} : vector<16x48xf32> to vector<16x16xf32>
    %37 = vector.extract_strided_slice %17 {offsets = [0, 128], sizes = [16, 128], strides = [1, 1]} : vector<16x384xf32> to vector<16x128xf32>
    %cst_24 = arith.constant dense<0.000000e+00> : vector<16x128xf32>
    %38 = tpu.matmul %36, %37, %cst_24 {dimension_numbers = #tpu.dot_dimension_numbers<[1], [0], [0], [1], [0, 0, 1, 1], [], []>} : vector<16x16xf32>, vector<16x128xf32>, vector<16x128xf32> -> vector<16x128xf32>
    %39 = arith.addf %35, %38 : vector<16x128xf32>
    %40 = vector.extract_strided_slice %30 {offsets = [0, 32], sizes = [16, 16], strides = [1, 1]} : vector<16x48xf32> to vector<16x16xf32>
    %41 = vector.extract_strided_slice %17 {offsets = [0, 256], sizes = [16, 128], strides = [1, 1]} : vector<16x384xf32> to vector<16x128xf32>
    %cst_25 = arith.constant dense<0.000000e+00> : vector<16x128xf32>
    %42 = tpu.matmul %40, %41, %cst_25 {dimension_numbers = #tpu.dot_dimension_numbers<[1], [0], [0], [1], [0, 0, 1, 1], [], []>} : vector<16x16xf32>, vector<16x128xf32>, vector<16x128xf32> -> vector<16x128xf32>
    %43 = arith.addf %39, %42 : vector<16x128xf32>
    %44 = arith.addf %0, %43 : vector<16x128xf32>
    %cst_26 = arith.constant 0.000000e+00 : f32
    %45 = vector.broadcast %cst_26 : f32 to vector<16x128xf32>
    %46 = arith.cmpf ogt, %44, %45 : vector<16x128xf32>
    %cst_27 = arith.constant 1.000000e-01 : f32
    %47 = vector.broadcast %cst_27 : f32 to vector<16x128xf32>
    %48 = arith.mulf %47, %44 : vector<16x128xf32>
    %49 = arith.select %46, %44, %48 : vector<16x128xi1>, vector<16x128xf32>
    %cst_28 = arith.constant dense<0.000000e+00> : vector<16x128xf32>
    %50 = tpu.matmul %49, %11, %cst_28 {dimension_numbers = #tpu.dot_dimension_numbers<[1], [0], [0], [1], [0, 0, 1, 1], [], []>} : vector<16x128xf32>, vector<128x128xf32>, vector<16x128xf32> -> vector<16x128xf32>
    %51 = vector.broadcast %12 : vector<1x128xf32> to vector<16x128xf32>
    %52 = arith.addf %50, %51 : vector<16x128xf32>
    %53 = arith.addf %0, %52 : vector<16x128xf32>
    %cst_29 = arith.constant 0.000000e+00 : f32
    %54 = vector.broadcast %cst_29 : f32 to vector<16x128xf32>
    %55 = arith.cmpf ogt, %53, %54 : vector<16x128xf32>
    %cst_30 = arith.constant 1.000000e-01 : f32
    %56 = vector.broadcast %cst_30 : f32 to vector<16x128xf32>
    %57 = arith.mulf %56, %53 : vector<16x128xf32>
    %58 = arith.select %55, %53, %57 : vector<16x128xi1>, vector<16x128xf32>
    %59 = vector.extract_strided_slice %58 {offsets = [0, 0], sizes = [16, 8], strides = [1, 1]} : vector<16x128xf32> to vector<16x8xf32>
    %60 = vector.shape_cast %59 : vector<16x8xf32> to vector<2x8x8xf32>
    %61 = tpu.transpose %60, [0, 2, 1] : vector<2x8x8xf32> -> vector<2x8x8xf32>
    %62 = vector.shape_cast %61 : vector<2x8x8xf32> to vector<16x8xf32>
    %63 = vector.extract_strided_slice %58 {offsets = [0, 8], sizes = [16, 8], strides = [1, 1]} : vector<16x128xf32> to vector<16x8xf32>
    %64 = vector.shape_cast %63 : vector<16x8xf32> to vector<2x8x8xf32>
    %65 = tpu.transpose %64, [0, 2, 1] : vector<2x8x8xf32> -> vector<2x8x8xf32>
    %66 = vector.shape_cast %65 : vector<2x8x8xf32> to vector<16x8xf32>
    %67 = vector.extract_strided_slice %58 {offsets = [0, 16], sizes = [16, 8], strides = [1, 1]} : vector<16x128xf32> to vector<16x8xf32>
    %68 = vector.shape_cast %67 : vector<16x8xf32> to vector<2x8x8xf32>
    %69 = tpu.transpose %68, [0, 2, 1] : vector<2x8x8xf32> -> vector<2x8x8xf32>
    %70 = vector.shape_cast %69 : vector<2x8x8xf32> to vector<16x8xf32>
    %71 = vector.extract_strided_slice %58 {offsets = [0, 24], sizes = [16, 8], strides = [1, 1]} : vector<16x128xf32> to vector<16x8xf32>
    %72 = vector.shape_cast %71 : vector<16x8xf32> to vector<2x8x8xf32>
    %73 = tpu.transpose %72, [0, 2, 1] : vector<2x8x8xf32> -> vector<2x8x8xf32>
    %74 = vector.shape_cast %73 : vector<2x8x8xf32> to vector<16x8xf32>
    %75 = vector.extract_strided_slice %58 {offsets = [0, 32], sizes = [16, 8], strides = [1, 1]} : vector<16x128xf32> to vector<16x8xf32>
    %76 = vector.shape_cast %75 : vector<16x8xf32> to vector<2x8x8xf32>
    %77 = tpu.transpose %76, [0, 2, 1] : vector<2x8x8xf32> -> vector<2x8x8xf32>
    %78 = vector.shape_cast %77 : vector<2x8x8xf32> to vector<16x8xf32>
    %79 = vector.extract_strided_slice %58 {offsets = [0, 40], sizes = [16, 8], strides = [1, 1]} : vector<16x128xf32> to vector<16x8xf32>
    %80 = vector.shape_cast %79 : vector<16x8xf32> to vector<2x8x8xf32>
    %81 = tpu.transpose %80, [0, 2, 1] : vector<2x8x8xf32> -> vector<2x8x8xf32>
    %82 = vector.shape_cast %81 : vector<2x8x8xf32> to vector<16x8xf32>
    %83 = vector.extract_strided_slice %58 {offsets = [0, 48], sizes = [16, 8], strides = [1, 1]} : vector<16x128xf32> to vector<16x8xf32>
    %84 = vector.shape_cast %83 : vector<16x8xf32> to vector<2x8x8xf32>
    %85 = tpu.transpose %84, [0, 2, 1] : vector<2x8x8xf32> -> vector<2x8x8xf32>
    %86 = vector.shape_cast %85 : vector<2x8x8xf32> to vector<16x8xf32>
    %87 = vector.extract_strided_slice %58 {offsets = [0, 56], sizes = [16, 8], strides = [1, 1]} : vector<16x128xf32> to vector<16x8xf32>
    %88 = vector.shape_cast %87 : vector<16x8xf32> to vector<2x8x8xf32>
    %89 = tpu.transpose %88, [0, 2, 1] : vector<2x8x8xf32> -> vector<2x8x8xf32>
    %90 = vector.shape_cast %89 : vector<2x8x8xf32> to vector<16x8xf32>
    %91 = vector.extract_strided_slice %58 {offsets = [0, 64], sizes = [16, 8], strides = [1, 1]} : vector<16x128xf32> to vector<16x8xf32>
    %92 = vector.shape_cast %91 : vector<16x8xf32> to vector<2x8x8xf32>
    %93 = tpu.transpose %92, [0, 2, 1] : vector<2x8x8xf32> -> vector<2x8x8xf32>
    %94 = vector.shape_cast %93 : vector<2x8x8xf32> to vector<16x8xf32>
    %95 = vector.extract_strided_slice %58 {offsets = [0, 72], sizes = [16, 8], strides = [1, 1]} : vector<16x128xf32> to vector<16x8xf32>
    %96 = vector.shape_cast %95 : vector<16x8xf32> to vector<2x8x8xf32>
    %97 = tpu.transpose %96, [0, 2, 1] : vector<2x8x8xf32> -> vector<2x8x8xf32>
    %98 = vector.shape_cast %97 : vector<2x8x8xf32> to vector<16x8xf32>
    %99 = vector.extract_strided_slice %58 {offsets = [0, 80], sizes = [16, 8], strides = [1, 1]} : vector<16x128xf32> to vector<16x8xf32>
    %100 = vector.shape_cast %99 : vector<16x8xf32> to vector<2x8x8xf32>
    %101 = tpu.transpose %100, [0, 2, 1] : vector<2x8x8xf32> -> vector<2x8x8xf32>
    %102 = vector.shape_cast %101 : vector<2x8x8xf32> to vector<16x8xf32>
    %103 = vector.extract_strided_slice %58 {offsets = [0, 88], sizes = [16, 8], strides = [1, 1]} : vector<16x128xf32> to vector<16x8xf32>
    %104 = vector.shape_cast %103 : vector<16x8xf32> to vector<2x8x8xf32>
    %105 = tpu.transpose %104, [0, 2, 1] : vector<2x8x8xf32> -> vector<2x8x8xf32>
    %106 = vector.shape_cast %105 : vector<2x8x8xf32> to vector<16x8xf32>
    %107 = vector.extract_strided_slice %58 {offsets = [0, 96], sizes = [16, 8], strides = [1, 1]} : vector<16x128xf32> to vector<16x8xf32>
    %108 = vector.shape_cast %107 : vector<16x8xf32> to vector<2x8x8xf32>
    %109 = tpu.transpose %108, [0, 2, 1] : vector<2x8x8xf32> -> vector<2x8x8xf32>
    %110 = vector.shape_cast %109 : vector<2x8x8xf32> to vector<16x8xf32>
    %111 = vector.extract_strided_slice %58 {offsets = [0, 104], sizes = [16, 8], strides = [1, 1]} : vector<16x128xf32> to vector<16x8xf32>
    %112 = vector.shape_cast %111 : vector<16x8xf32> to vector<2x8x8xf32>
    %113 = tpu.transpose %112, [0, 2, 1] : vector<2x8x8xf32> -> vector<2x8x8xf32>
    %114 = vector.shape_cast %113 : vector<2x8x8xf32> to vector<16x8xf32>
    %115 = vector.extract_strided_slice %58 {offsets = [0, 112], sizes = [16, 8], strides = [1, 1]} : vector<16x128xf32> to vector<16x8xf32>
    %116 = vector.shape_cast %115 : vector<16x8xf32> to vector<2x8x8xf32>
    %117 = tpu.transpose %116, [0, 2, 1] : vector<2x8x8xf32> -> vector<2x8x8xf32>
    %118 = vector.shape_cast %117 : vector<2x8x8xf32> to vector<16x8xf32>
    %119 = vector.extract_strided_slice %58 {offsets = [0, 120], sizes = [16, 8], strides = [1, 1]} : vector<16x128xf32> to vector<16x8xf32>
    %120 = vector.shape_cast %119 : vector<16x8xf32> to vector<2x8x8xf32>
    %121 = tpu.transpose %120, [0, 2, 1] : vector<2x8x8xf32> -> vector<2x8x8xf32>
    %122 = vector.shape_cast %121 : vector<2x8x8xf32> to vector<16x8xf32>
    %123 = tpu.concatenate %62, %66, %70, %74, %78, %82, %86, %90, %94, %98, %102, %106, %110, %114, %118, %122 in 1 : vector<16x8xf32>, vector<16x8xf32>, vector<16x8xf32>, vector<16x8xf32>, vector<16x8xf32>, vector<16x8xf32>, vector<16x8xf32>, vector<16x8xf32>, vector<16x8xf32>, vector<16x8xf32>, vector<16x8xf32>, vector<16x8xf32>, vector<16x8xf32>, vector<16x8xf32>, vector<16x8xf32>, vector<16x8xf32> -> vector<16x128xf32>
    %c0_31 = arith.constant 0 : index
    %c0_32 = arith.constant 0 : index
    %124 = vector.load %arg3[%c0_31, %c0_32] : memref<16x128xf32, #tpu.memory_space<vmem>>, vector<16x128xf32>
    %c0_33 = arith.constant 0 : index
    %c0_34 = arith.constant 0 : index
    %125 = vector.load %arg12[%c0_33, %c0_34] : memref<128x384xbf16, #tpu.memory_space<vmem>>, vector<128x384xbf16>
    %126 = arith.extf %125 : vector<128x384xbf16> to vector<128x384xf32>
    %c0_35 = arith.constant 0 : index
    %c0_36 = arith.constant 0 : index
    %127 = vector.load %arg13[%c0_35, %c0_36] : memref<1x384xf32, #tpu.memory_space<vmem>>, vector<1x384xf32>
    %c0_37 = arith.constant 0 : index
    %c0_38 = arith.constant 0 : index
    %128 = vector.load %arg14[%c0_37, %c0_38] : memref<16x48xf32, #tpu.memory_space<vmem>>, vector<16x48xf32>
    %c0_39 = arith.constant 0 : index
    %c0_40 = arith.constant 0 : index
    %129 = vector.load %arg15[%c0_39, %c0_40] : memref<16x48xf32, #tpu.memory_space<vmem>>, vector<16x48xf32>
    %c0_41 = arith.constant 0 : index
    %c0_42 = arith.constant 0 : index
    %130 = vector.load %arg16[%c0_41, %c0_42] : memref<128x384xbf16, #tpu.memory_space<vmem>>, vector<128x384xbf16>
    %131 = arith.extf %130 : vector<128x384xbf16> to vector<128x384xf32>
    %c0_43 = arith.constant 0 : index
    %c0_44 = arith.constant 0 : index
    %132 = vector.load %arg17[%c0_43, %c0_44] : memref<1x128xf32, #tpu.memory_space<vmem>>, vector<1x128xf32>
    %c0_45 = arith.constant 0 : index
    %c0_46 = arith.constant 0 : index
    %133 = vector.load %arg18[%c0_45, %c0_46] : memref<128x128xbf16, #tpu.memory_space<vmem>>, vector<128x128xbf16>
    %134 = arith.extf %133 : vector<128x128xbf16> to vector<128x128xf32>
    %c0_47 = arith.constant 0 : index
    %c0_48 = arith.constant 0 : index
    %135 = vector.load %arg19[%c0_47, %c0_48] : memref<1x128xf32, #tpu.memory_space<vmem>>, vector<1x128xf32>
    %136 = arith.addf %123, %124 : vector<16x128xf32>
    %cst_49 = arith.constant dense<0.000000e+00> : vector<16x384xf32>
    %137 = tpu.matmul %136, %126, %cst_49 {dimension_numbers = #tpu.dot_dimension_numbers<[1], [0], [0], [1], [0, 0, 1, 1], [], []>} : vector<16x128xf32>, vector<128x384xf32>, vector<16x384xf32> -> vector<16x384xf32>
    %138 = vector.broadcast %127 : vector<1x384xf32> to vector<16x384xf32>
    %139 = arith.addf %137, %138 : vector<16x384xf32>
    %cst_50 = arith.constant dense<0.000000e+00> : vector<16x384xf32>
    %140 = tpu.matmul %123, %131, %cst_50 {dimension_numbers = #tpu.dot_dimension_numbers<[1], [0], [0], [1], [0, 0, 1, 1], [], []>} : vector<16x128xf32>, vector<128x384xf32>, vector<16x384xf32> -> vector<16x384xf32>
    %141 = vector.extract_strided_slice %139 {offsets = [0, 192], sizes = [16, 64], strides = [1, 1]} : vector<16x384xf32> to vector<16x64xf32>
    %142 = vector.extract_strided_slice %139 {offsets = [0, 0], sizes = [16, 64], strides = [1, 1]} : vector<16x384xf32> to vector<16x64xf32>
    %cst_51 = arith.constant dense<0.000000e+00> : vector<16x16xf32>
    %143 = tpu.matmul %141, %142, %cst_51 {dimension_numbers = #tpu.dot_dimension_numbers<[1], [1], [0], [0], [0, 0, 1, 0], [], []>} : vector<16x64xf32>, vector<16x64xf32>, vector<16x16xf32> -> vector<16x16xf32>
    %144 = vector.extract_strided_slice %139 {offsets = [0, 256], sizes = [16, 64], strides = [1, 1]} : vector<16x384xf32> to vector<16x64xf32>
    %145 = vector.extract_strided_slice %139 {offsets = [0, 64], sizes = [16, 64], strides = [1, 1]} : vector<16x384xf32> to vector<16x64xf32>
    %cst_52 = arith.constant dense<0.000000e+00> : vector<16x16xf32>
    %146 = tpu.matmul %144, %145, %cst_52 {dimension_numbers = #tpu.dot_dimension_numbers<[1], [1], [0], [0], [0, 0, 1, 0], [], []>} : vector<16x64xf32>, vector<16x64xf32>, vector<16x16xf32> -> vector<16x16xf32>
    %147 = vector.extract_strided_slice %139 {offsets = [0, 320], sizes = [16, 64], strides = [1, 1]} : vector<16x384xf32> to vector<16x64xf32>
    %148 = vector.extract_strided_slice %139 {offsets = [0, 128], sizes = [16, 64], strides = [1, 1]} : vector<16x384xf32> to vector<16x64xf32>
    %cst_53 = arith.constant dense<0.000000e+00> : vector<16x16xf32>
    %149 = tpu.matmul %147, %148, %cst_53 {dimension_numbers = #tpu.dot_dimension_numbers<[1], [1], [0], [0], [0, 0, 1, 0], [], []>} : vector<16x64xf32>, vector<16x64xf32>, vector<16x16xf32> -> vector<16x16xf32>
    %150 = tpu.concatenate %143, %146, %149 in 1 : vector<16x16xf32>, vector<16x16xf32>, vector<16x16xf32> -> vector<16x48xf32>
    %151 = math.tanh %150 : vector<16x48xf32>
    %152 = arith.mulf %151, %129 : vector<16x48xf32>
    %153 = arith.addf %152, %128 : vector<16x48xf32>
    %154 = vector.extract_strided_slice %153 {offsets = [0, 0], sizes = [16, 16], strides = [1, 1]} : vector<16x48xf32> to vector<16x16xf32>
    %155 = vector.extract_strided_slice %140 {offsets = [0, 0], sizes = [16, 128], strides = [1, 1]} : vector<16x384xf32> to vector<16x128xf32>
    %cst_54 = arith.constant dense<0.000000e+00> : vector<16x128xf32>
    %156 = tpu.matmul %154, %155, %cst_54 {dimension_numbers = #tpu.dot_dimension_numbers<[1], [0], [0], [1], [0, 0, 1, 1], [], []>} : vector<16x16xf32>, vector<16x128xf32>, vector<16x128xf32> -> vector<16x128xf32>
    %157 = vector.broadcast %132 : vector<1x128xf32> to vector<16x128xf32>
    %158 = arith.addf %157, %156 : vector<16x128xf32>
    %159 = vector.extract_strided_slice %153 {offsets = [0, 16], sizes = [16, 16], strides = [1, 1]} : vector<16x48xf32> to vector<16x16xf32>
    %160 = vector.extract_strided_slice %140 {offsets = [0, 128], sizes = [16, 128], strides = [1, 1]} : vector<16x384xf32> to vector<16x128xf32>
    %cst_55 = arith.constant dense<0.000000e+00> : vector<16x128xf32>
    %161 = tpu.matmul %159, %160, %cst_55 {dimension_numbers = #tpu.dot_dimension_numbers<[1], [0], [0], [1], [0, 0, 1, 1], [], []>} : vector<16x16xf32>, vector<16x128xf32>, vector<16x128xf32> -> vector<16x128xf32>
    %162 = arith.addf %158, %161 : vector<16x128xf32>
    %163 = vector.extract_strided_slice %153 {offsets = [0, 32], sizes = [16, 16], strides = [1, 1]} : vector<16x48xf32> to vector<16x16xf32>
    %164 = vector.extract_strided_slice %140 {offsets = [0, 256], sizes = [16, 128], strides = [1, 1]} : vector<16x384xf32> to vector<16x128xf32>
    %cst_56 = arith.constant dense<0.000000e+00> : vector<16x128xf32>
    %165 = tpu.matmul %163, %164, %cst_56 {dimension_numbers = #tpu.dot_dimension_numbers<[1], [0], [0], [1], [0, 0, 1, 1], [], []>} : vector<16x16xf32>, vector<16x128xf32>, vector<16x128xf32> -> vector<16x128xf32>
    %166 = arith.addf %162, %165 : vector<16x128xf32>
    %167 = arith.addf %123, %166 : vector<16x128xf32>
    %cst_57 = arith.constant 0.000000e+00 : f32
    %168 = vector.broadcast %cst_57 : f32 to vector<16x128xf32>
    %169 = arith.cmpf ogt, %167, %168 : vector<16x128xf32>
    %cst_58 = arith.constant 1.000000e-01 : f32
    %170 = vector.broadcast %cst_58 : f32 to vector<16x128xf32>
    %171 = arith.mulf %170, %167 : vector<16x128xf32>
    %172 = arith.select %169, %167, %171 : vector<16x128xi1>, vector<16x128xf32>
    %cst_59 = arith.constant dense<0.000000e+00> : vector<16x128xf32>
    %173 = tpu.matmul %172, %134, %cst_59 {dimension_numbers = #tpu.dot_dimension_numbers<[1], [0], [0], [1], [0, 0, 1, 1], [], []>} : vector<16x128xf32>, vector<128x128xf32>, vector<16x128xf32> -> vector<16x128xf32>
    %174 = vector.broadcast %135 : vector<1x128xf32> to vector<16x128xf32>
    %175 = arith.addf %173, %174 : vector<16x128xf32>
    %176 = arith.addf %123, %175 : vector<16x128xf32>
    %cst_60 = arith.constant 0.000000e+00 : f32
    %177 = vector.broadcast %cst_60 : f32 to vector<16x128xf32>
    %178 = arith.cmpf ogt, %176, %177 : vector<16x128xf32>
    %cst_61 = arith.constant 1.000000e-01 : f32
    %179 = vector.broadcast %cst_61 : f32 to vector<16x128xf32>
    %180 = arith.mulf %179, %176 : vector<16x128xf32>
    %181 = arith.select %178, %176, %180 : vector<16x128xi1>, vector<16x128xf32>
    %c0_62 = arith.constant 0 : index
    %c0_63 = arith.constant 0 : index
    %182 = vector.load %arg20[%c0_62, %c0_63] : memref<16x128xf32, #tpu.memory_space<vmem>>, vector<16x128xf32>
    tpu.vector_store %arg20[%c0_62, %c0_63], %181 {strides = array<i32>} : memref<16x128xf32, #tpu.memory_space<vmem>>, vector<16x128xf32>,
    return
  }
  func.func @transform_0(%arg0: i32) -> (i32, i32) {
    %c0_i32 = arith.constant 0 : i32
    %c0_i32_0 = arith.constant 0 : i32
    %c0_i32_1 = arith.constant 0 : i32
    return %c0_i32, %c0_i32_0 : i32, i32
  }
  func.func @transform_1(%arg0: i32) -> (i32, i32) {
    %c0_i32 = arith.constant 0 : i32
    %c0_i32_0 = arith.constant 0 : i32
    %c0_i32_1 = arith.constant 0 : i32
    return %c0_i32, %c0_i32_0 : i32, i32
  }
  func.func @transform_2(%arg0: i32) -> (i32, i32) {
    %c0_i32 = arith.constant 0 : i32
    %c0_i32_0 = arith.constant 0 : i32
    %c0_i32_1 = arith.constant 0 : i32
    return %c0_i32, %c0_i32_0 : i32, i32
  }
  func.func @transform_3(%arg0: i32) -> (i32, i32) {
    %c0_i32 = arith.constant 0 : i32
    %c0_i32_0 = arith.constant 0 : i32
    %c0_i32_1 = arith.constant 0 : i32
    return %c0_i32, %c0_i32_0 : i32, i32
  }
  func.func @transform_4(%arg0: i32) -> (i32, i32) {
    %c0_i32 = arith.constant 0 : i32
    %c0_i32_0 = arith.constant 0 : i32
    %c0_i32_1 = arith.constant 0 : i32
    return %c0_i32, %c0_i32_0 : i32, i32
  }
  func.func @transform_5(%arg0: i32) -> (i32, i32) {
    %c0_i32 = arith.constant 0 : i32
    %c0_i32_0 = arith.constant 0 : i32
    %c0_i32_1 = arith.constant 0 : i32
    return %c0_i32, %c0_i32_0 : i32, i32
  }
  func.func @transform_6(%arg0: i32) -> (i32, i32) {
    %c0_i32 = arith.constant 0 : i32
    %c0_i32_0 = arith.constant 0 : i32
    %c0_i32_1 = arith.constant 0 : i32
    return %c0_i32, %c0_i32_0 : i32, i32
  }
  func.func @transform_7(%arg0: i32) -> (i32, i32) {
    %c0_i32 = arith.constant 0 : i32
    %c0_i32_0 = arith.constant 0 : i32
    %c0_i32_1 = arith.constant 0 : i32
    return %c0_i32, %c0_i32_0 : i32, i32
  }
  func.func @transform_8(%arg0: i32) -> (i32, i32) {
    %c0_i32 = arith.constant 0 : i32
    %c0_i32_0 = arith.constant 0 : i32
    %c0_i32_1 = arith.constant 0 : i32
    return %c0_i32, %c0_i32_0 : i32, i32
  }
  func.func @transform_9(%arg0: i32) -> (i32, i32) {
    %c0_i32 = arith.constant 0 : i32
    %c0_i32_0 = arith.constant 0 : i32
    %c0_i32_1 = arith.constant 0 : i32
    return %c0_i32, %c0_i32_0 : i32, i32
  }
  func.func @transform_10(%arg0: i32) -> (i32, i32) {
    %c0_i32 = arith.constant 0 : i32
    %c0_i32_0 = arith.constant 0 : i32
    %c0_i32_1 = arith.constant 0 : i32
    return %c0_i32, %c0_i32_0 : i32, i32
  }
  func.func @transform_11(%arg0: i32) -> (i32, i32) {
    %c0_i32 = arith.constant 0 : i32
    %c0_i32_0 = arith.constant 0 : i32
    %c0_i32_1 = arith.constant 0 : i32
    return %c0_i32, %c0_i32_0 : i32, i32
  }
  func.func @transform_12(%arg0: i32) -> (i32, i32) {
    %c0_i32 = arith.constant 0 : i32
    %c0_i32_0 = arith.constant 0 : i32
    %c0_i32_1 = arith.constant 0 : i32
    return %c0_i32, %c0_i32_0 : i32, i32
  }
  func.func @transform_13(%arg0: i32) -> (i32, i32) {
    %c0_i32 = arith.constant 0 : i32
    %c0_i32_0 = arith.constant 0 : i32
    %c0_i32_1 = arith.constant 0 : i32
    return %c0_i32, %c0_i32_0 : i32, i32
  }
  func.func @transform_14(%arg0: i32) -> (i32, i32) {
    %c0_i32 = arith.constant 0 : i32
    %c0_i32_0 = arith.constant 0 : i32
    %c0_i32_1 = arith.constant 0 : i32
    return %c0_i32, %c0_i32_0 : i32, i32
  }
  func.func @transform_15(%arg0: i32) -> (i32, i32) {
    %c0_i32 = arith.constant 0 : i32
    %c0_i32_0 = arith.constant 0 : i32
    %c0_i32_1 = arith.constant 0 : i32
    return %c0_i32, %c0_i32_0 : i32, i32
  }
  func.func @transform_16(%arg0: i32) -> (i32, i32) {
    %c0_i32 = arith.constant 0 : i32
    %c0_i32_0 = arith.constant 0 : i32
    %c0_i32_1 = arith.constant 0 : i32
    return %c0_i32, %c0_i32_0 : i32, i32
  }
  func.func @transform_17(%arg0: i32) -> (i32, i32) {
    %c0_i32 = arith.constant 0 : i32
    %c0_i32_0 = arith.constant 0 : i32
    %c0_i32_1 = arith.constant 0 : i32
    return %c0_i32, %c0_i32_0 : i32, i32
  }
  func.func @transform_18(%arg0: i32) -> (i32, i32) {
    %c0_i32 = arith.constant 0 : i32
    %c0_i32_0 = arith.constant 0 : i32
    %c0_i32_1 = arith.constant 0 : i32
    return %c0_i32, %c0_i32_0 : i32, i32
  }
  func.func @transform_19(%arg0: i32) -> (i32, i32) {
    %c0_i32 = arith.constant 0 : i32
    %c0_i32_0 = arith.constant 0 : i32
    %c0_i32_1 = arith.constant 0 : i32
    return %c0_i32, %c0_i32_0 : i32, i32
  }
}

</mosaic_0001>

<bundles_post_ra>
// kernel: st_attention_block.1
= control target key start
LH: loop header
LB: loop body
LE: loop exit
PB: predicated region body
PF: predicated region fallthrough
CT: control target
= control target key end

     0   :  { %s6234_s0 = inlined_call_operand.vmem [shape: f32[16,128], index: 0, kind: input, shape index: {}]   ;;  %s6235_s1 = inlined_call_operand.hbm [shape: f32[16,128], index: 1, kind: input, shape index: {}]   ;;  %s6236_s2 = inlined_call_operand.hbm [shape: f32[16,128], index: 2, kind: input, shape index: {}]   ;;  %s6237_s3 = inlined_call_operand.vmem [shape: bf16[128,384], index: 3, kind: input, shape index: {}]   ;;  %s6238_s4 = inlined_call_operand.vmem [shape: f32[1,384], index: 4, kind: input, shape index: {}]   ;;  %s6239_s5 = inlined_call_operand.hbm [shape: f32[16,48], index: 5, kind: input, shape index: {}]   ;;  %s6240_s6 = inlined_call_operand.hbm [shape: f32[16,48], index: 6, kind: input, shape index: {}]   ;;  %s6241_s7 = inlined_call_operand.vmem [shape: bf16[128,384], index: 7, kind: input, shape index: {}]   ;;  %s6242_s8 = inlined_call_operand.vmem [shape: f32[1,128], index: 8, kind: input, shape index: {}]   ;;  %s6243_s9 = inlined_call_operand.vmem [shape: bf16[128,128], index: 9, kind: input, shape index: {}]   ;;  %s6244_s10 = inlined_call_operand.vmem [shape: f32[1,128], index: 10, kind: input, shape index: {}]   ;;  %s6245_s11 = inlined_call_operand.vmem [shape: bf16[128,384], index: 11, kind: input, shape index: {}]   ;;  %s6246_s12 = inlined_call_operand.hbm [shape: f32[1,384], index: 12, kind: input, shape index: {}]   ;;  %s6247_s13 = inlined_call_operand.hbm [shape: f32[16,48], index: 13, kind: input, shape index: {}]   ;;  %s6248_s14 = inlined_call_operand.hbm [shape: f32[16,48], index: 14, kind: input, shape index: {}]   ;;  %s6249_s15 = inlined_call_operand.hbm [shape: bf16[128,384], index: 15, kind: input, shape index: {}]   ;;  %s6250_s16 = inlined_call_operand.hbm [shape: f32[1,128], index: 16, kind: input, shape index: {}]   ;;  %s6251_s17 = inlined_call_operand.vmem [shape: bf16[128,128], index: 17, kind: input, shape index: {}]   ;;  %s6252_s18 = inlined_call_operand.hbm [shape: f32[1,128], index: 18, kind: input, shape index: {}]   ;;  %s6253_s19 = inlined_call_operand.vmem [shape: f32[16,128], index: 19, kind: output, shape index: {}]  }
   0x1   :  { %6261 = sst [smem:[#allocation24_spill]] %s6234_s0 }
   0x2   :  { %6262 = sst [smem:[#allocation25_spill]] %s6235_s1 }
   0x3   :  { %6263 = sst [smem:[#allocation26_spill]] %s6236_s2 }
   0x4   :  { %6264 = sst [smem:[#allocation27_spill]] %s6237_s3 }
   0x5   :  { %6265 = sst [smem:[#allocation28_spill]] %s6253_s19 }
   0x6   :  { %24 = vsyncpa [#allocation3], 0 }
   0x7   :  { %25 = vsyncpa [#allocation5], 0 }
   0x8   :  { %26 = vsyncpa [#allocation8], 0 }
   0x9   :  { %27 = vsyncpa [#allocation11], 0 }
   0xa   :  { %28 = vsyncpa [#allocation14], 0 }
   0xb   :  { %29 = vsyncpa [#allocation17], 0  ;;  %s5326_s0 = smov [#allocation4]   ;;  %s5327_s20 = smov [#allocation7]  }
   0xc   :  { %s49_s30 = sshll.u32 %s5326_s0, 4  ;;  %s77_s21 = sshll.u32 %s5327_s20, 4  ;;  %s50_s30 = int_to_ptr.vmem [resolvable:$true] %s49_s30  ;;  %s5455_s21 = int_to_ptr.vmem [resolvable:$true] %s77_s21 }
   0xd   :  { %s6266_s2 = sld [smem:[#allocation26_spill]] }
  0x13   :  { %s5094_s23 = scalar_lea.hbm %s6266_s2, 256 }
  0x14   :  { %p5095_p0 = scmp.ne.s32.totalorder %s6266_s2, %s5094_s23  ;;  %p5098_p1 = scmp.lt.u32.totalorder %s5094_s23, %s6266_s2 }
  0x16   :  { %p5100_p2 = pnand %p5098_p1, %p5095_p0 }
  0x18   :  { %5103 = shalt.err (!%p5100_p2)
}
  0x19   :  { %s5104_s27 = scalar_lea.vmem %s50_s30, 256  ;;  %p5109_p4 = scmp.lt.s32.totalorder %s50_s30, %s50_s30 }
  0x1a   :  { %p5105_p3 = scmp.ne.s32.totalorder %s50_s30, %s5104_s27  ;;  %p5110_p5 = scmp.lt.s32.totalorder %s5104_s27, %s5104_s27 }
  0x1c   :  { %p5111_p6 = por %p5110_p5, %p5109_p4 }
  0x1e   :  { %p5112_p7 = pnand %p5111_p6, %p5105_p3 }
  0x20   :  { %5115 = shalt.err (!%p5112_p7)
}
  0x21   :  { %s6259_s28 = smov 128   ;;  %s5329_s29 = smov 8  }
  0x22   :  { %55 = dma.hbm_to_vmem [thread:$0]  %s6266_s2, 256, %s50_s30, [#allocation5], %s6259_s28, %s6259_s28, %s5329_s29  }
  0x23   :  { %s5116_s23 = scalar_lea.hbm %s6240_s6, 256 }
  0x24   :  { %p5117_p8 = scmp.ne.s32.totalorder %s6240_s6, %s5116_s23  ;;  %p5120_p9 = scmp.lt.u32.totalorder %s5116_s23, %s6240_s6 }
  0x26   :  { %p5122_p10 = pnand %p5120_p9, %p5117_p8 }
  0x28   :  { %5125 = shalt.err (!%p5122_p10)
}
  0x29   :  { %s5126_s27 = scalar_lea.vmem %s5455_s21, 256  ;;  %p5131_p12 = scmp.lt.s32.totalorder %s5455_s21, %s5455_s21 }
  0x2a   :  { %p5127_p11 = scmp.ne.s32.totalorder %s5455_s21, %s5126_s27  ;;  %p5132_p13 = scmp.lt.s32.totalorder %s5126_s27, %s5126_s27 }
  0x2c   :  { %p5133_p0 = por %p5132_p13, %p5131_p12 }
  0x2e   :  { %p5134_p1 = pnand %p5133_p0, %p5127_p11 }
  0x30   :  { %5137 = shalt.err (!%p5134_p1)
}
  0x31   :  { %83 = dma.hbm_to_vmem [thread:$0]  %s6240_s6, 256, %s5455_s21, [#allocation8], %s6259_s28, %s6259_s28, %s5329_s29  }
  0x32   :  { %s5330_s0 = smov [#allocation10]   ;;  %s5331_s1 = smov [#allocation13]  }
  0x33   :  { %s109_s20 = sshll.u32 %s5330_s0, 4  ;;  %s133_s22 = sshll.u32 %s5331_s1, 4  ;;  %s110_s20 = int_to_ptr.vmem [resolvable:$true] %s109_s20  ;;  %s5492_s22 = int_to_ptr.vmem [resolvable:$true] %s133_s22 }
  0x34   :  { %s5138_s25 = scalar_lea.hbm %s6247_s13, 256 }
  0x35   :  { %p5139_p2 = scmp.ne.s32.totalorder %s6247_s13, %s5138_s25  ;;  %p5142_p3 = scmp.lt.u32.totalorder %s5138_s25, %s6247_s13 }
  0x37   :  { %p5144_p4 = pnand %p5142_p3, %p5139_p2 }
  0x39   :  { %5147 = shalt.err (!%p5144_p4)
}
  0x3a   :  { %s5148_s6 = scalar_lea.vmem %s110_s20, 256  ;;  %p5153_p6 = scmp.lt.s32.totalorder %s110_s20, %s110_s20 }
  0x3b   :  { %p5149_p5 = scmp.ne.s32.totalorder %s110_s20, %s5148_s6  ;;  %p5154_p7 = scmp.lt.s32.totalorder %s5148_s6, %s5148_s6 }
  0x3d   :  { %p5155_p8 = por %p5154_p7, %p5153_p6 }
  0x3f   :  { %p5156_p9 = pnand %p5155_p8, %p5149_p5 }
  0x41   :  { %5159 = shalt.err (!%p5156_p9)
}
  0x42   :  { %115 = dma.hbm_to_vmem [thread:$0]  %s6247_s13, 256, %s110_s20, [#allocation11], %s6259_s28, %s6259_s28, %s5329_s29  }
  0x43   :  { %s5160_s19 = scalar_lea.hbm %s6249_s15, 3072 }
  0x44   :  { %p5161_p10 = scmp.ne.s32.totalorder %s6249_s15, %s5160_s19  ;;  %p5164_p11 = scmp.lt.u32.totalorder %s5160_s19, %s6249_s15 }
  0x46   :  { %p5166_p12 = pnand %p5164_p11, %p5161_p10 }
  0x48   :  { %5169 = shalt.err (!%p5166_p12)
}
  0x49   :  { %s5170_s3 = scalar_lea.vmem %s5492_s22, 3072  ;;  %p5175_p0 = scmp.lt.s32.totalorder %s5492_s22, %s5492_s22 }
  0x4a   :  { %p5171_p13 = scmp.ne.s32.totalorder %s5492_s22, %s5170_s3  ;;  %p5176_p1 = scmp.lt.s32.totalorder %s5170_s3, %s5170_s3 }
  0x4c   :  { %p5177_p2 = por %p5176_p1, %p5175_p0 }
  0x4e   :  { %p5178_p3 = pnand %p5177_p2, %p5171_p13 }
  0x50   :  { %5181 = shalt.err (!%p5178_p3)
}
  0x51   :  { %s5332_s13 = smov 192   ;;  %s5333_s20 = smov 12  }
  0x52   :  { %139 = dma.hbm_to_vmem [thread:$0]  %s6249_s15, 3072, %s5492_s22, [#allocation14], %s5332_s13, %s5332_s13, %s5333_s20  }
  0x53   :  { %s5334_s6 = smov [#allocation2]   ;;  %s5335_s30 = smov [#allocation6]  }
  0x54   :  { %s37_s21 = sshll.u32 %s5334_s6, 4  ;;  %s65_s2 = sshll.u32 %s5335_s30, 4  ;;  %s38_s21 = int_to_ptr.vmem [resolvable:$true] %s37_s21  ;;  %s5526_s2 = int_to_ptr.vmem [resolvable:$true] %s65_s2 }
  0x55   :  { %s6267_s1 = sld [smem:[#allocation25_spill]] }
  0x5b   :  { %s5182_s23 = scalar_lea.hbm %s6267_s1, 256 }
  0x5c   :  { %p5183_p4 = scmp.ne.s32.totalorder %s6267_s1, %s5182_s23  ;;  %p5186_p5 = scmp.lt.u32.totalorder %s5182_s23, %s6267_s1 }
  0x5e   :  { %p5188_p6 = pnand %p5186_p5, %p5183_p4 }
  0x60   :  { %5191 = shalt.err (!%p5188_p6)
}
  0x61   :  { %s5192_s15 = scalar_lea.vmem %s38_s21, 256  ;;  %p5197_p8 = scmp.lt.s32.totalorder %s38_s21, %s38_s21 }
  0x62   :  { %p5193_p7 = scmp.ne.s32.totalorder %s38_s21, %s5192_s15  ;;  %p5198_p9 = scmp.lt.s32.totalorder %s5192_s15, %s5192_s15 }
  0x64   :  { %p5199_p10 = por %p5198_p9, %p5197_p8 }
  0x66   :  { %p5200_p11 = pnand %p5199_p10, %p5193_p7 }
  0x68   :  { %5203 = shalt.err (!%p5200_p11)
}
  0x69   :  { %s6268_s22 = smov 128   ;;  %s5204_s28 = scalar_lea.hbm %s6239_s5, 256 }
  0x6a   :  { %43 = dma.hbm_to_vmem [thread:$0]  %s6267_s1, 256, %s38_s21, [#allocation3], %s6268_s22, %s6268_s22, %s5329_s29  }
  0x6b   :  { %p5205_p12 = scmp.ne.s32.totalorder %s6239_s5, %s5204_s28  ;;  %p5208_p13 = scmp.lt.u32.totalorder %s5204_s28, %s6239_s5 }
  0x6d   :  { %p5210_p0 = pnand %p5208_p13, %p5205_p12 }
  0x6f   :  { %5213 = shalt.err (!%p5210_p0)
}
  0x70   :  { %s5214_s23 = scalar_lea.vmem %s5526_s2, 256  ;;  %p5219_p2 = scmp.lt.s32.totalorder %s5526_s2, %s5526_s2 }
  0x71   :  { %p5215_p1 = scmp.ne.s32.totalorder %s5526_s2, %s5214_s23  ;;  %p5220_p3 = scmp.lt.s32.totalorder %s5214_s23, %s5214_s23 }
  0x73   :  { %p5221_p4 = por %p5220_p3, %p5219_p2 }
  0x75   :  { %p5222_p5 = pnand %p5221_p4, %p5215_p1 }
  0x77   :  { %5225 = shalt.err (!%p5222_p5)
}
  0x78   :  { %71 = dma.hbm_to_vmem [thread:$0]  %s6239_s5, 256, %s5526_s2, [#allocation5], %s6268_s22, %s6268_s22, %s5329_s29  }
  0x79   :  { %s5336_s24 = smov [#allocation9]   ;;  %s5337_s3 = smov [#allocation12]  }
  0x7a   :  { %s100_s25 = sshll.u32 %s5336_s24, 4  ;;  %s121_s15 = sshll.u32 %s5337_s3, 4  ;;  %s101_s25 = int_to_ptr.vmem [resolvable:$true] %s100_s25  ;;  %s5563_s15 = int_to_ptr.vmem [resolvable:$true] %s121_s15 }
  0x7b   :  { %s5226_s26 = scalar_lea.hbm %s6246_s12, 48 }
  0x7c   :  { %p5227_p6 = scmp.ne.s32.totalorder %s6246_s12, %s5226_s26  ;;  %p5230_p7 = scmp.lt.u32.totalorder %s5226_s26, %s6246_s12 }
  0x7e   :  { %p5232_p8 = pnand %p5230_p7, %p5227_p6 }
  0x80   :  { %5235 = shalt.err (!%p5232_p8)
}
  0x81   :  { %s5236_s5 = scalar_lea.vmem %s101_s25, 48  ;;  %s5240_s2 = scalar_lea.vmem %s101_s25, 64 }
  0x82   :  { %p5237_p9 = scmp.ne.s32.totalorder %s101_s25, %s5236_s5  ;;  %p5241_p10 = scmp.lt.s32.totalorder %s101_s25, %s101_s25 }
  0x83   :  { %p5242_p11 = scmp.lt.s32.totalorder %s5240_s2, %s5236_s5 }
  0x85   :  { %p5243_p12 = por %p5242_p11, %p5241_p10 }
  0x87   :  { %p5244_p13 = pnand %p5243_p12, %p5237_p9 }
  0x89   :  { %5247 = shalt.err (!%p5244_p13)
}
  0x8a   :  { %103 = dma.hbm_to_vmem [thread:$0]  %s6246_s12, 48, %s101_s25, [#allocation8]  }
  0x8b   :  { %s5248_s1 = scalar_lea.hbm %s6248_s14, 256 }
  0x8c   :  { %p5249_p0 = scmp.ne.s32.totalorder %s6248_s14, %s5248_s1  ;;  %p5252_p1 = scmp.lt.u32.totalorder %s5248_s1, %s6248_s14 }
  0x8e   :  { %p5254_p2 = pnand %p5252_p1, %p5249_p0 }
  0x90   :  { %5257 = shalt.err (!%p5254_p2)
}
  0x91   :  { %s5258_s26 = scalar_lea.vmem %s5563_s15, 256  ;;  %p5263_p4 = scmp.lt.s32.totalorder %s5563_s15, %s5563_s15 }
  0x92   :  { %p5259_p3 = scmp.ne.s32.totalorder %s5563_s15, %s5258_s26  ;;  %p5264_p5 = scmp.lt.s32.totalorder %s5258_s26, %s5258_s26 }
  0x94   :  { %p5265_p6 = por %p5264_p5, %p5263_p4 }
  0x96   :  { %p5266_p7 = pnand %p5265_p6, %p5259_p3 }
  0x98   :  { %5269 = shalt.err (!%p5266_p7)
}
  0x99   :  { %127 = dma.hbm_to_vmem [thread:$0]  %s6248_s14, 256, %s5563_s15, [#allocation11], %s6268_s22, %s6268_s22, %s5329_s29  }
  0x9a   :  { %s5338_s27 = smov [#allocation15]   ;;  %s5339_s6 = smov [#allocation16]  }
  0x9b   :  { %s146_s28 = sshll.u32 %s5338_s27, 4  ;;  %s158_s30 = sshll.u32 %s5339_s6, 4  ;;  %s147_s28 = int_to_ptr.vmem [resolvable:$true] %s146_s28  ;;  %s159_s30 = int_to_ptr.vmem [resolvable:$true] %s158_s30 }
  0x9c   :  { %s5270_s0 = scalar_lea.hbm %s6250_s16, 16 }
  0x9d   :  { %p5271_p8 = scmp.ne.s32.totalorder %s6250_s16, %s5270_s0  ;;  %p5274_p9 = scmp.lt.u32.totalorder %s5270_s0, %s6250_s16 }
  0x9f   :  { %p5276_p10 = pnand %p5274_p9, %p5271_p8 }
  0xa1   :  { %5279 = shalt.err (!%p5276_p10)
}
  0xa2   :  { %s5280_s14 = scalar_lea.vmem %s147_s28, 16  ;;  %s5284_s22 = scalar_lea.vmem %s147_s28, 32 }
  0xa3   :  { %p5281_p11 = scmp.ne.s32.totalorder %s147_s28, %s5280_s14  ;;  %p5285_p12 = scmp.lt.s32.totalorder %s147_s28, %s147_s28 }
  0xa4   :  { %p5286_p13 = scmp.lt.s32.totalorder %s5284_s22, %s5280_s14 }
  0xa6   :  { %p5287_p0 = por %p5286_p13, %p5285_p12 }
  0xa8   :  { %p5288_p1 = pnand %p5287_p0, %p5281_p11 }
  0xaa   :  { %5291 = shalt.err (!%p5288_p1)
}
  0xab   :  { %149 = dma.hbm_to_vmem [thread:$0]  %s6250_s16, 16, %s147_s28, [#allocation14]  }
  0xac   :  { %s5292_s20 = scalar_lea.hbm %s6252_s18, 16 }
  0xad   :  { %p5293_p2 = scmp.ne.s32.totalorder %s6252_s18, %s5292_s20  ;;  %p5296_p3 = scmp.lt.u32.totalorder %s5292_s20, %s6252_s18 }
  0xaf   :  { %p5298_p4 = pnand %p5296_p3, %p5293_p2 }
  0xb1   :  { %5301 = shalt.err (!%p5298_p4)
}
  0xb2   :  { %s5302_s6 = scalar_lea.vmem %s159_s30, 16  ;;  %s5306_s5 = scalar_lea.vmem %s159_s30, 32 }
  0xb3   :  { %p5303_p5 = scmp.ne.s32.totalorder %s159_s30, %s5302_s6  ;;  %p5307_p6 = scmp.lt.s32.totalorder %s159_s30, %s159_s30 }
  0xb4   :  { %p5308_p7 = scmp.lt.s32.totalorder %s5306_s5, %s5302_s6 }
  0xb6   :  { %p5309_p8 = por %p5308_p7, %p5307_p6 }
  0xb8   :  { %p5310_p9 = pnand %p5309_p8, %p5303_p5 }
  0xba   :  { %5313 = shalt.err (!%p5310_p9)
}
  0xbb   :  { %161 = dma.hbm_to_vmem [thread:$0]  %s6252_s18, 16, %s159_s30, [#allocation17]  }
  0xbc   :  { %5314 = dma.done.wait [#allocation3], 256  }
  0xbd   :  { %5315 = vsyncadd [#allocation3], 4294967040 }
  0xbe   :  { %5316 = dma.done.wait [#allocation5], 512  }
  0xbf   :  { %5317 = vsyncadd [#allocation5], 4294966784 }
  0xc0   :  { %5318 = dma.done.wait [#allocation8], 304  }
  0xc1   :  { %5319 = vsyncadd [#allocation8], 4294966992 }
  0xc2   :  { %5320 = dma.done.wait [#allocation11], 512  }
  0xc3   :  { %5321 = vsyncadd [#allocation11], 4294966784 }
  0xc4   :  { %5322 = dma.done.wait [#allocation14], 3088  }
  0xc5   :  { %5323 = vsyncadd [#allocation14], 4294964208 }
  0xc6   :  { %5324 = dma.done.wait [#allocation17], 16  }
  0xc7   :  { %5325 = vsyncadd [#allocation17], 4294967280  ;;  %v5340_v0 = vmov 0.0   ;;  %s6269_s19 = sld [smem:[#allocation27_spill]]  ;;  %s6270_s22 = sld [smem:[#allocation24_spill]]  ;;  %v194_v16 = vld [vmem:[#allocation2] sm:$0xff]  ;;  %v398_v55 = vlaneseq }
  0xc8   :  { %477 = vmatprep.mubr.f32.mxu0 %v5340_v0  ;;  %v4991_v27 = vld [vmem:[%s6241_s7 + $0x4] ss:$12 sps:$4 sm:$0xff]   ;;  %v195_v29 = vld [vmem:[#allocation2 + $0x8] sm:$0xff]  ;;  %v4999_v36 = vld [vmem:[%s6241_s7 + $0x34] ss:$12 sps:$4 sm:$0xff]   ;;  %vm723_vm0 = vcmask 523264  }
  0xc9   :  { %v4993_v31 = vld [vmem:[%s6241_s7] ss:$12 sps:$4 sm:$0xff]   ;;  %v4995_v32 = vld [vmem:[%s6241_s7 + $0x1c] ss:$12 sps:$4 sm:$0xff]   ;;  %v4997_v35 = vld [vmem:[%s6241_s7 + $0x18] ss:$12 sps:$4 sm:$0xff]  }
  0xca   :  { %v4990_v34 = vld [vmem:[%s6241_s7 + $0x8] ss:$12 sps:$4 sm:$0xff]   ;;  %v4994_v37 = vld [vmem:[%s6241_s7 + $0x20] ss:$12 sps:$4 sm:$0xff]   ;;  %v5001_v38 = vld [vmem:[%s6241_s7 + $0x30] ss:$12 sps:$4 sm:$0xff]  }
  0xcb   :  { %v5003_v39 = vld [vmem:[%s6241_s7 + $0x4c] ss:$12 sps:$4 sm:$0xff]   ;;  %v5005_v41 = vld [vmem:[%s6241_s7 + $0x48] ss:$12 sps:$4 sm:$0xff]   ;;  %v5007_v42 = vld [vmem:[%s6241_s7 + $0x64] ss:$12 sps:$4 sm:$0xff]  }
  0xcc   :  { %v4998_v40 = vld [vmem:[%s6241_s7 + $0x38] ss:$12 sps:$4 sm:$0xff]   ;;  %v5002_v43 = vld [vmem:[%s6241_s7 + $0x50] ss:$12 sps:$4 sm:$0xff]   ;;  %v5009_v44 = vld [vmem:[%s6241_s7 + $0x60] ss:$12 sps:$4 sm:$0xff]  }
  0xcd   :  { %v4958_v1 = vld [vmem:[%s6269_s19 + $0x4] ss:$12 sps:$4 sm:$0xff]   ;;  %v4960_v2 = vld [vmem:[%s6269_s19] ss:$12 sps:$4 sm:$0xff]   ;;  %v4961_v3 = vld [vmem:[%s6269_s19 + $0x1c] ss:$12 sps:$4 sm:$0xff]  }
  0xce   :  { %4400 = vmatprep.subr.bf16.mxu0 %v4958_v1  ;;  %v4963_v4 = vld [vmem:[%s6269_s19 + $0x18] ss:$12 sps:$4 sm:$0xff]   ;;  %v4964_v5 = vld [vmem:[%s6269_s19 + $0x34] ss:$12 sps:$4 sm:$0xff]   ;;  %v4966_v6 = vld [vmem:[%s6269_s19 + $0x30] ss:$12 sps:$4 sm:$0xff]  }
  0xcf   :  { %4402 = vmatpush1.bf16.msra.mxu0 %v4960_v2  ;;  %v4973_v7 = vld [vmem:[%s6269_s19 + $0x8] ss:$12 sps:$4 sm:$0xff]   ;;  %v4967_v8 = vld [vmem:[%s6269_s19 + $0x4c] ss:$12 sps:$4 sm:$0xff]   ;;  %v4970_v11 = vld [vmem:[%s6269_s19 + $0x64] ss:$12 sps:$4 sm:$0xff]  }
  0xd0   :  { %4404 = vmatprep.subr.bf16.mxu0 %v4961_v3  ;;  %4432 = vmatprep.subr.bf16.mxu1 %v4973_v7  ;;  %v4977_v9 = vld [vmem:[%s6269_s19 + $0x20] ss:$12 sps:$4 sm:$0xff]   ;;  %v4969_v10 = vld [vmem:[%s6269_s19 + $0x48] ss:$12 sps:$4 sm:$0xff]   ;;  %v4981_v12 = vld [vmem:[%s6269_s19 + $0x38] ss:$12 sps:$4 sm:$0xff]  }
  0xd1   :  { %4434 = vmatpush3.bf16.msra.mxu1 %v4973_v7  ;;  %v4972_v13 = vld [vmem:[%s6269_s19 + $0x60] ss:$12 sps:$4 sm:$0xff]   ;;  %v4985_v14 = vld [vmem:[%s6269_s19 + $0x50] ss:$12 sps:$4 sm:$0xff]   ;;  %v4976_v19 = vld [vmem:[%s6269_s19 + $0x78] ss:$12 sps:$4 sm:$0xff]  }
  0xd2   :  { %4436 = vmatprep.subr.bf16.mxu1 %v4977_v9  ;;  %v5667_v15 = vld [vmem:[%s6270_s22] sm:$0xff]  ;;  %v4974_v17 = vld [vmem:[%s6269_s19 + $0x7c] ss:$12 sps:$4 sm:$0xff]   ;;  %v4982_v24 = vld [vmem:[%s6269_s19 + $0xac] ss:$12 sps:$4 sm:$0xff]   ;;  %v5785_v56 = vshrl.u32 %v398_v55, 7 }
  0xd3   :  { %4406 = vmatpush1.bf16.msra.mxu0 %v4963_v4  ;;  %v395_v18 = vadd.f32 %v194_v16, %v5667_v15  ;;  %v4986_v20 = vld [vmem:[%s6269_s19 + $0x68] ss:$12 sps:$4 sm:$0xff]   ;;  %v4980_v22 = vld [vmem:[%s6269_s19 + $0x90] ss:$12 sps:$4 sm:$0xff]   ;;  %v4987_v23 = vld [vmem:[%s6269_s19 + $0x80] ss:$12 sps:$4 sm:$0xff]  }
  0xd4   :  { %4408 = vmatprep.subr.bf16.mxu0 %v4964_v5  ;;  %v4978_v21 = vld [vmem:[%s6269_s19 + $0x94] ss:$12 sps:$4 sm:$0xff]   ;;  %v4988_v26 = vld [vmem:[%s6269_s19 + $0x98] ss:$12 sps:$4 sm:$0xff]   ;;  %v5703_v28 = vld [vmem:[%s6270_s22 + $0x8] sm:$0xff]  ;;  %v400_v57 = vsub.s32 0, %v5785_v56 }
  0xd5   :  { %4438 = vmatpush3.bf16.msra.mxu1 %v4977_v9  ;;  %4137 = vmatprep.mubr.f32.mxu1 %v395_v18  ;;  %v4984_v25 = vld [vmem:[%s6269_s19 + $0xa8] ss:$12 sps:$4 sm:$0xff]   ;;  %v4989_v30 = vld [vmem:[%s6269_s19 + $0xb0] ss:$12 sps:$4 sm:$0xff]   ;;  %v396_v33 = vadd.f32 %v195_v29, %v5703_v28  ;;  %v5013_v47 = vld [vmem:[%s6241_s7 + $0x78] ss:$12 sps:$4 sm:$0xff]  }
  0xd6   :  { %4440 = vmatprep.subr.bf16.mxu1 %v4981_v12  ;;  %v5011_v45 = vld [vmem:[%s6241_s7 + $0x7c] ss:$12 sps:$4 sm:$0xff]   ;;  %v5015_v48 = vld [vmem:[%s6241_s7 + $0x94] ss:$12 sps:$4 sm:$0xff]   ;;  %v5014_v51 = vld [vmem:[%s6241_s7 + $0x98] ss:$12 sps:$4 sm:$0xff]  }
  0xd7   :  { %4410 = vmatpush1.bf16.msra.mxu0 %v4966_v6  ;;  %v5006_v46 = vld [vmem:[%s6241_s7 + $0x68] ss:$12 sps:$4 sm:$0xff]   ;;  %v5010_v49 = vld [vmem:[%s6241_s7 + $0x80] ss:$12 sps:$4 sm:$0xff]   ;;  %v5017_v50 = vld [vmem:[%s6241_s7 + $0x90] ss:$12 sps:$4 sm:$0xff]  }
  0xd8   :  { %4412 = vmatprep.subr.bf16.mxu0 %v4967_v8  ;;  %v5018_v52 = vld [vmem:[%s6241_s7 + $0xb0] ss:$12 sps:$4 sm:$0xff]   ;;  %v5019_v53 = vld [vmem:[%s6241_s7 + $0xac] ss:$12 sps:$4 sm:$0xff]   ;;  %v5021_v54 = vld [vmem:[%s6241_s7 + $0xa8] ss:$12 sps:$4 sm:$0xff]  }
  0xd9   :  { %4442 = vmatpush3.bf16.msra.mxu1 %v4981_v12  ;;  %v276_v58 = vld [vmem:[%s6238_s4] sm:$0x7]  ;;  %v404_v59 = vsub.s32 1, %v5785_v56  ;;  %v408_v63 = vsub.s32 2, %v5785_v56  ;;  %vm5801_vm1 = vmpackc.low %vm723_vm0, %vm723_vm0  ;;  %s5341_s4 = smov 64   ;;  %s5342_s7 = smov 16  }
  0xda   :  { %4444 = vmatprep.subr.bf16.mxu1 %v4985_v14  ;;  %v401_v61 = vrot.slane %v276_v58, %v400_v57  ;;  %s5343_s26 = smov 32   ;;  %vm1001_vm2 = vcmask 130048   ;;  %vm1004_vm3 = vcmask 261120   ;;  %s5344_s27 = smov 112   ;;  %vm2605_vm8 = vcmask 64512  }
  0xdb   :  { %4414 = vmatpush1.bf16.msra.mxu0 %v4969_v10  ;;  %v405_v1 = vrot.slane %v276_v58, %v404_v59  ;;  %v409_v6 = vrot.slane %v276_v58, %v408_v63  ;;  %v277_v58 = vld [vmem:[#allocation6] sm:$0xff]  ;;  %s5345_s16 = smov 96   ;;  %s5347_s20 = smov 120   ;;  %vm2610_vm9 = vcmask 195584   ;;  %vm2615_vm10 = vcmask 326656  }
  0xdc   :  { %4416 = vmatprep.subr.bf16.mxu0 %v4970_v11  ;;  %s5349_s12 = smov 88   ;;  %s5350_s22 = smov 80   ;;  %vm2618_vm11 = vcmask 392192   ;;  %vm2621_vm12 = vcmask 457728   ;;  %vm2626_vm13 = vcmask 588800   ;;  %vm2629_vm14 = vcmask 654336  }
  0xdd   :  { %4446 = vmatpush3.bf16.msra.mxu1 %v4985_v14  ;;  %s5351_s25 = smov 72   ;;  %s5352_s19 = smov 56   ;;  %vm2632_vm15 = vcmask 719872  }
  0xde   :  { %4448 = vmatprep.subr.bf16.mxu1 %v4986_v20  ;;  %s5353_s6 = smov 48   ;;  %s5354_s5 = smov 40  }
  0xdf   :  { %4418 = vmatpush1.bf16.msra.mxu0 %v4972_v13  ;;  %s6273_s24 = sld [smem:[#allocation28_spill]] }
  0xe0   :  { %4420 = vmatprep.subr.bf16.mxu0 %v4974_v17 }
  0xe1   :  { %4450 = vmatpush3.bf16.msra.mxu1 %v4986_v20 }
  0xe2   :  { %4452 = vmatprep.subr.bf16.mxu1 %v4987_v23 }
  0xe3   :  { %4422 = vmatpush1.bf16.msra.mxu0 %v4976_v19 }
  0xe4   :  { %4424 = vmatprep.subr.bf16.mxu0 %v4978_v21 }
  0xe5   :  { %4454 = vmatpush3.bf16.msra.mxu1 %v4987_v23 }
  0xe6   :  { %4456 = vmatprep.subr.bf16.mxu1 %v4988_v26 }
  0xe7   :  { %4426 = vmatpush1.bf16.msra.mxu0 %v4980_v22 }
  0xe8   :  { %4428 = vmatprep.subr.bf16.mxu0 %v4982_v24 }
  0xe9   :  { %4458 = vmatpush3.bf16.msra.mxu1 %v4988_v26 }
  0xea   :  { %4460 = vmatprep.subr.bf16.mxu1 %v4989_v30 }
  0xeb   :  { %4430 = vmatpush1.bf16.msra.mxu0 %v4984_v25 }
  0xec   :  { %4464 = vmatprep.subr.bf16.mxu0 %v4991_v27 }
  0xed   :  { %4462 = vmatpush3.bf16.msra.mxu1 %v4989_v30 }
  0xee   :  { %478 = vmatmul.mubr.f32.vlgmr.msra.gmra.mrb[0].mxu0 %v395_v18  ;;  %4496 = vmatprep.subr.bf16.mxu1 %v4990_v34 }
  0xef   :  { %483 = vmatprep.mubr.f32.mxu0 %v5340_v0  ;;  %4466 = vmatpush1.bf16.msra.mxu0 %v4993_v31 }
  0xf0   :  { %4468 = vmatprep.subr.bf16.mxu0 %v4995_v32  ;;  %4138 = vmatmul.mubr.f32.vlgmr.msra.gmra.mrb[0].mxu1 %v396_v33 }
  0xf1   :  { %4498 = vmatpush3.bf16.msra.mxu1 %v4990_v34  ;;  %4172 = vmatprep.mubr.f32.mxu1 %v5667_v15 }
  0xf2   :  { %484 = vmatmul.mubr.f32.gmra.mrb[2].mxu0 %v396_v33  ;;  %4500 = vmatprep.subr.bf16.mxu1 %v4994_v37 }
  0xf3   :  { %629 = vmatprep.mubr.f32.mxu0 %v5340_v0  ;;  %4470 = vmatpush1.bf16.msra.mxu0 %v4997_v35 }
  0xf4   :  { %4472 = vmatprep.subr.bf16.mxu0 %v4999_v36 }
  0xf5   :  { %4502 = vmatpush3.bf16.msra.mxu1 %v4994_v37 }
  0xf6   :  { %4504 = vmatprep.subr.bf16.mxu1 %v4998_v40 }
  0xf7   :  { %4474 = vmatpush1.bf16.msra.mxu0 %v5001_v38 }
  0xf8   :  { %4476 = vmatprep.subr.bf16.mxu0 %v5003_v39 }
  0xf9   :  { %4506 = vmatpush3.bf16.msra.mxu1 %v4998_v40 }
  0xfa   :  { %4508 = vmatprep.subr.bf16.mxu1 %v5002_v43 }
  0xfb   :  { %4478 = vmatpush1.bf16.msra.mxu0 %v5005_v41 }
  0xfc   :  { %4480 = vmatprep.subr.bf16.mxu0 %v5007_v42 }
  0xfd   :  { %4510 = vmatpush3.bf16.msra.mxu1 %v5002_v43 }
  0xfe   :  { %4512 = vmatprep.subr.bf16.mxu1 %v5006_v46 }
  0xff   :  { %4482 = vmatpush1.bf16.msra.mxu0 %v5009_v44 }
 0x100   :  { %4484 = vmatprep.subr.bf16.mxu0 %v5011_v45 }
 0x101   :  { %4514 = vmatpush3.bf16.msra.mxu1 %v5006_v46 }
 0x102   :  { %4516 = vmatprep.subr.bf16.mxu1 %v5010_v49 }
 0x103   :  { %4486 = vmatpush1.bf16.msra.mxu0 %v5013_v47 }
 0x104   :  { %4488 = vmatprep.subr.bf16.mxu0 %v5015_v48 }
 0x105   :  { %4518 = vmatpush3.bf16.msra.mxu1 %v5010_v49 }
 0x106   :  { %4520 = vmatprep.subr.bf16.mxu1 %v5014_v51 }
 0x107   :  { %4490 = vmatpush1.bf16.msra.mxu0 %v5017_v50  ;;  %v280_v50 = vld [vmem:[#allocation7 + $0x8] sm:$0xff] }
 0x108   :  { %4492 = vmatprep.subr.bf16.mxu0 %v5019_v53  ;;  %v278_v53 = vld [vmem:[#allocation6 + $0x8] sm:$0xff] }
 0x109   :  { %4522 = vmatpush3.bf16.msra.mxu1 %v5014_v51  ;;  %v279_v51 = vld [vmem:[#allocation7] sm:$0xff] }
 0x10a   :  { %4524 = vmatprep.subr.bf16.mxu1 %v5018_v52 }
 0x10b   :  { %4494 = vmatpush1.bf16.msra.mxu0 %v5021_v54 }
 0x10d   :  { %4526 = vmatpush3.bf16.msra.mxu1 %v5018_v52 }
 0x10e   :  { %630 = vmatmul.mubr.f32.vlgmr.msra.gmra.mrb[4].mxu0 %v5667_v15 }
 0x10f   :  { %635 = vmatprep.mubr.f32.mxu0 %v5340_v0 }
 0x110   :  { %4173 = vmatmul.mubr.f32.vlgmr.msra.gmra.mrb[2].mxu1 %v5703_v28 }
 0x112   :  { %636 = vmatmul.mubr.f32.gmra.mrb[6].mxu0 %v5703_v28 }
 0x1c1   :  { %v479_v60 = vpop.f32.mrb[0].mxu0 }
 0x1c2   :  { %v481_v62 = vpop.f32.mrb[1].mxu0  ;;  %v480_v3 = vadd.f32 %v479_v60, %v401_v61 }
 0x1c3   :  { %v482_v7 = vadd.f32 %v481_v62, %v405_v1  ;;  %v4139_v12 = vpop.f32.mrb[0].mxu1  ;;  %v3935_v62 = vld [vmem:[%s6243_s9 + $0x8] sm:$0xff]  }
 0x1c4   :  { %v556_v14 = vpop.f32.mrb[1].mxu1  ;;  %v562_v17 = vadd.f32 %v4139_v12, %v409_v6  ;;  %v3940_v12 = vld [vmem:[%s6243_s9 + $0x30] sm:$0xff]  }
 0x1c5   :  { %v485_v2 = vpop.f32.mrb[2].mxu0  ;;  %v557_v16 = vadd.f32 %v556_v14, %v409_v6  ;;  %v3939_v6 = vld [vmem:[%s6243_s9 + $0x28] sm:$0xff]   ;;  %v3845_v14 = vld [vmem:[%s6242_s8] ss:$0 sm:$0xff]  ;;  %s5346_s8 = smov 24  }
 0x1c6   :  { %v486_v4 = vadd.f32 %v485_v2, %v401_v61  ;;  %v487_v5 = vpop.f32.mrb[3].mxu0  ;;  %v3872_v61 = vld [vmem:[%s6243_s9] sm:$0xff]  }
 0x1c7   :  { %v488_v8 = vadd.f32 %v487_v5, %v405_v1  ;;  %v3938_v5 = vld [vmem:[%s6243_s9 + $0x20] sm:$0xff]  }
 0x1c8   :  { %v4527_v10 = vpack.c.bf16 %v486_v4, %v480_v3  ;;  %v4948_v11 = vpack.i.bf16 %v486_v4, %v480_v3  ;;  %v3936_v3 = vld [vmem:[%s6243_s9 + $0x10] sm:$0xff]   ;;  %v3937_v4 = vld [vmem:[%s6243_s9 + $0x18] sm:$0xff]  }
 0x1c9   :  { %v4539_v13 = vpack.c.bf16 %v488_v8, %v482_v7  ;;  %721 = vrot.lane.b32.xlu1 %v488_v8, %s5341_s4 }
 0x1ca   :  { %4949 = vrot.lane.b32.xlu0 %v4948_v11, %s5341_s4  ;;  %4529 = vmatprep.subr.msk.bf16.mxu1 %vm5801_vm1, %v4527_v10 }
 0x1cb   :  { %4532 = vmatpush3.bf16.xpose.msk.msra.mxu1 %vm5801_vm1, %v4527_v10  ;;  %4541 = vmatprep.subr.msk.bf16.mxu0 %vm5801_vm1, %v4539_v13 }
 0x1cc   :  { %4544 = vmatpush3.bf16.xpose.msk.msra.mxu0 %vm5801_vm1, %v4539_v13  ;;  %v3941_v13 = vld [vmem:[%s6243_s9 + $0x38] sm:$0xff]  }
 0x1cd   :  { %898 = vrot.lane.b32.xlu1 %v557_v16, %s5341_s4  ;;  %4558 = vmatprep.subr.bf16.mxu0 %v3872_v61 }
 0x1ce   :  { %719 = vrot.lane.b32.xlu0 %v482_v7, %s5341_s4 }
 0x1d2   :  { %900 = vrot.lane.b32.xlu0 %v562_v17, %s5341_s4 }
 0x1e1   :  { %v631_v20 = vpop.f32.mrb[4].mxu0 }
 0x1e2   :  { %v633_v22 = vpop.f32.mrb[5].mxu0 }
 0x1e3   :  { %v4174_v18 = vpop.f32.mrb[2].mxu1 }
 0x1e4   :  { %v708_v19 = vpop.f32.mrb[3].mxu1 }
 0x1e5   :  { %v5818_v21 = vpack.c.bf16 %v4174_v18, %v708_v19  ;;  %v637_v32 = vpop.f32.mrb[6].mxu0 }
 0x1e6   :  { %v4545_v33 = vpack.c.bf16 %v637_v32, %v631_v20  ;;  %v639_v34 = vpop.f32.mrb[7].mxu0 }
 0x1e7   :  { %v4549_v35 = vpack.c.bf16 %v639_v34, %v633_v22 }
 0x23b   :  { %v722_v23 = vpop.permute.xlu1 %721 }
 0x23c   :  { %v4950_v24 = vpop.permute.xlu0 %4949 }
 0x23d   :  { %v4952_v25 = vunpack.i.h.bf16 %v4950_v24  ;;  %v4951_v26 = vunpack.i.l.bf16 %v4950_v24 }
 0x23f   :  { %v4533_v27 = vpack.c.bf16 %v4952_v25, %v4951_v26  ;;  %v899_v29 = vpop.permute.xlu1 %898  ;;  %v3850_v26 = vld [vmem:[%s6244_s10] ss:$0 sm:$0xff]  ;;  %s5348_s10 = smov 104  }
 0x240   :  { %v720_v30 = vpop.permute.xlu0 %719  ;;  %4193 = vmatprep.mubr.msk.f32.mxu0 %vm723_vm0, %v899_v29 }
 0x241   :  { %4179 = vmatprep.mubr.msk.f32.mxu1 %vm723_vm0, %v720_v30  ;;  %4535 = vmatprep.subr.msk.bf16.mxu1 %vm5801_vm1, %v4533_v27 }
 0x242   :  { %4180 = vmatmul.mubr.msk.f32.vlgmr.msra.gmra.mrb[4].mxu1 %vm723_vm0, %v722_v23 }
 0x243   :  { %4538 = vmatpush3.bf16.xpose.msk.msra.mxu1 %vm5801_vm1, %v4533_v27  ;;  %4186 = vmatprep.mubr.msk.f32.mxu1 %vm723_vm0, %v557_v16 }
 0x244   :  { %v901_v31 = vpop.permute.xlu0 %900  ;;  %4546 = vmatprep.subr.bf16.mxu1 %v4545_v33 }
 0x245   :  { %4194 = vmatmul.mubr.msk.f32.vlgmr.msra.gmra.mrb[8].mxu0 %vm723_vm0, %v901_v31 }
 0x246   :  { %4560 = vmatpush3.bf16.msra.mxu0 %v3872_v61 }
 0x247   :  { %4562 = vmatprep.subr.bf16.mxu0 %v3935_v62 }
 0x24a   :  { %4187 = vmatmul.mubr.msk.f32.vlgmr.msra.gmra.mrb[6].mxu1 %vm723_vm0, %v562_v17  ;;  %4564 = vmatpush3.bf16.msra.mxu0 %v3935_v62 }
 0x24b   :  { %4548 = vmatpush3.bf16.msra.mxu1 %v4545_v33  ;;  %4566 = vmatprep.subr.bf16.mxu0 %v3936_v3 }
 0x24c   :  { %4550 = vmatprep.subr.bf16.mxu1 %v4549_v35 }
 0x24e   :  { %4568 = vmatpush3.bf16.msra.mxu0 %v3936_v3 }
 0x24f   :  { %4570 = vmatprep.subr.bf16.mxu0 %v3937_v4 }
 0x252   :  { %4572 = vmatpush3.bf16.msra.mxu0 %v3937_v4 }
 0x253   :  { %4574 = vmatprep.subr.bf16.mxu0 %v3938_v5 }
 0x256   :  { %4576 = vmatpush3.bf16.msra.mxu0 %v3938_v5 }
 0x257   :  { %4578 = vmatprep.subr.bf16.mxu0 %v3939_v6 }
 0x25a   :  { %4580 = vmatpush3.bf16.msra.mxu0 %v3939_v6 }
 0x25b   :  { %4582 = vmatprep.subr.bf16.mxu0 %v3940_v12 }
 0x25e   :  { %4584 = vmatpush3.bf16.msra.mxu0 %v3940_v12 }
 0x25f   :  { %4586 = vmatprep.subr.bf16.mxu0 %v3941_v13 }
 0x262   :  { %4588 = vmatpush3.bf16.msra.mxu0 %v3941_v13 }
 0x315   :  { %v4181_v36 = vpop.f32.mrb[4].mxu1 }
 0x316   :  { %v800_v37 = vpop.f32.mrb[5].mxu1 }
 0x318   :  { %v4195_v38 = vpop.f32.mrb[8].mxu0 }
 0x319   :  { %v976_v39 = vpop.f32.mrb[9].mxu0 }
 0x31d   :  { %v4188_v40 = vpop.f32.mrb[6].mxu1 }
 0x31e   :  { %989 = vrot.lane.b32.xlu0 %v4188_v40, %s5342_s7  ;;  %v889_v41 = vpop.f32.mrb[7].mxu1 }
 0x31f   :  { %987 = vrot.lane.b32.xlu1 %v889_v41, %s5342_s7 }
 0x322   :  { %997 = vrot.lane.b32.xlu0 %v4195_v38, %s5343_s26 }
 0x323   :  { %995 = vrot.lane.b32.xlu1 %v976_v39, %s5343_s26 }
 0x390   :  { %v990_v42 = vpop.permute.xlu0 %989 }
 0x391   :  { %v988_v43 = vpop.permute.xlu1 %987  ;;  %v1003_v44 = vsel %vm1001_vm2, %v4181_v36, %v990_v42 }
 0x392   :  { %v1002_v46 = vsel %vm1001_vm2, %v800_v37, %v988_v43 }
 0x394   :  { %v998_v45 = vpop.permute.xlu0 %997 }
 0x395   :  { %v1006_v47 = vsel %vm1004_vm3, %v1003_v44, %v998_v45  ;;  %v996_v48 = vpop.permute.xlu1 %995 }
 0x396   :  { %5086 = vtanh.f32 %v1006_v47  ;;  %v1005_v49 = vsel %vm1004_vm3, %v1002_v46, %v996_v48 }
 0x397   :  { %5088 = vtanh.f32 %v1005_v49 }
 0x3a0   :  { %v5087_v52 = vpop.eup %5086 }
 0x3a1   :  { %v5089_v54 = vpop.eup %5088  ;;  %v1010_v55 = vmul.f32 %v5087_v52, %v280_v50 }
 0x3a2   :  { %v1009_v60 = vmul.f32 %v5089_v54, %v279_v51 }
 0x3a3   :  { %v1012_v1 = vadd.f32 %v1010_v55, %v278_v53 }
 0x3a4   :  { %v1011_v2 = vadd.f32 %v1009_v60, %v277_v58 }
 0x3a5   :  { %1104 = vrot.lane.b32.xlu0 %v1012_v1, %s5344_s27 }
 0x3a6   :  { %1102 = vrot.lane.b32.xlu1 %v1011_v2, %s5344_s27  ;;  %4200 = vmatprep.mubr.msk.f32.mxu1 %vm1001_vm2, %v1011_v2 }
 0x3a7   :  { %4201 = vmatmul.mubr.msk.f32.vlgmr.msra.gmra.mrb[8].mxu1 %vm1001_vm2, %v1012_v1 }
 0x3a8   :  { %4552 = vmatpush3.bf16.msra.mxu1 %v4549_v35 }
 0x3a9   :  { %4554 = vmatprep.subr.bf16.mxu1 %v5818_v21  ;;  %1189 = vrot.lane.b32.xlu0 %v1012_v1, %s5345_s16 }
 0x3aa   :  { %1187 = vrot.lane.b32.xlu1 %v1011_v2, %s5345_s16 }
 0x417   :  { %v1105_v8 = vpop.permute.xlu0 %1104 }
 0x418   :  { %v1103_v7 = vpop.permute.xlu1 %1102 }
 0x419   :  { %4207 = vmatprep.mubr.msk.f32.mxu1 %vm1001_vm2, %v1103_v7 }
 0x41a   :  { %4208 = vmatmul.mubr.msk.f32.vlgmr.msra.gmra.mrb[8].mxu1 %vm1001_vm2, %v1105_v8 }
 0x41b   :  { %4556 = vmatpush3.bf16.msra.mxu1 %v5818_v21  ;;  %v1190_v11 = vpop.permute.xlu0 %1189 }
 0x41c   :  { %v1188_v10 = vpop.permute.xlu1 %1187 }
 0x41d   :  { %4214 = vmatprep.mubr.msk.f32.mxu1 %vm1001_vm2, %v1188_v10 }
 0x422   :  { %4215 = vmatmul.mubr.msk.f32.vlgmr.msra.gmra.mrb[8].mxu1 %vm1001_vm2, %v1190_v11 }
 0x423   :  { %2930 = vmatprep.mubr.f32.mxu1 %v5340_v0 }
 0x4f5   :  { %v4216_v16 = vpop.f32.mrb[8].mxu1 }
 0x4f6   :  { %v4779_v17 = vadd.f32 %v4216_v16, %v3845_v14  ;;  %v1261_v18 = vpop.f32.mrb[9].mxu1 }
 0x4f7   :  { %v4780_v19 = vadd.f32 %v3845_v14, %v1261_v18 }
 0x4f8   :  { %v1273_v20 = vadd.f32 %v4779_v17, %v5703_v28 }
 0x4f9   :  { %v1272_v21 = vadd.f32 %v4780_v19, %v5667_v15 }
 0x4fa   :  { %v1277_v22 = vmul.f32 0.1, %v1273_v20  ;;  %vm1275_vm5 = vcmp.gt.f32.partialorder %v1273_v20, 0.0 }
 0x4fb   :  { %vm1274_vm4 = vcmp.gt.f32.partialorder %v1272_v21, 0.0  ;;  %v1276_v23 = vmul.f32 0.1, %v1272_v21 }
 0x4fc   :  { %v1279_v25 = vsel %vm1275_vm5, %v1273_v20, %v1277_v22  ;;  %vm2638_vm5 = vcmask 850944  }
 0x4fd   :  { %v1278_v24 = vsel %vm1274_vm4, %v1272_v21, %v1276_v23  ;;  %vm2635_vm4 = vcmask 785408  }
 0x4fe   :  { %4249 = vmatprep.mubr.f32.mxu0 %v1278_v24 }
 0x4ff   :  { %4250 = vmatmul.mubr.f32.vlgmr.msra.gmra.mrb[10].mxu0 %v1279_v25 }
 0x5d2   :  { %v4251_v27 = vpop.f32.mrb[10].mxu0 }
 0x5d3   :  { %v1358_v29 = vadd.f32 %v4251_v27, %v3850_v26  ;;  %v1352_v30 = vpop.f32.mrb[11].mxu0 }
 0x5d4   :  { %v1353_v32 = vadd.f32 %v3850_v26, %v1352_v30 }
 0x5d5   :  { %v1362_v31 = vadd.f32 %v1358_v29, %v5703_v28 }
 0x5d6   :  { %v1361_v35 = vadd.f32 %v1353_v32, %v5667_v15 }
 0x5d7   :  { %vm1364_vm6 = vcmp.gt.f32.partialorder %v1362_v31, 0.0  ;;  %v1366_v33 = vmul.f32 0.1, %v1362_v31 }
 0x5d8   :  { %v1365_v36 = vmul.f32 0.1, %v1361_v35  ;;  %vm1363_vm7 = vcmp.gt.f32.partialorder %v1361_v35, 0.0 }
 0x5d9   :  { %v5884_v34 = vsel %vm1364_vm6, %v1362_v31, %v1366_v33  ;;  %vm2641_vm6 = vcmask 916480  }
 0x5da   :  { %2277 = vrot.lane.b32.xlu0 %v5884_v34, %s5346_s8  ;;  %1437 = vrot.lane.b32.xlu1 %v5884_v34, %s5347_s20  ;;  %v5895_v28 = vsel %vm1363_vm7, %v1361_v35, %v1365_v36  ;;  %v5022_v36 = vld [vmem:[%s6245_s11 + $0x4] ss:$12 sps:$4 sm:$0xff]   ;;  %vm2644_vm7 = vcmask 982016  }
 0x5db   :  { %4590 = vmatprep.subr.bf16.mxu1 %v5022_v36 }
 0x5de   :  { %2417 = vrot.lane.b32.xlu0 %v5884_v34, %s5329_s29  ;;  %1507 = vrot.lane.b32.xlu1 %v5884_v34, %s5344_s27 }
 0x5e2   :  { %1577 = vrot.lane.b32.xlu1 %v5884_v34, %s5348_s10  ;;  %1505 = vrot.lane.b32.xlu0 %v5895_v28, %s5344_s27 }
 0x5e6   :  { %1647 = vrot.lane.b32.xlu1 %v5884_v34, %s5345_s16  ;;  %1645 = vrot.lane.b32.xlu0 %v5895_v28, %s5345_s16 }
 0x5ea   :  { %1717 = vrot.lane.b32.xlu1 %v5884_v34, %s5349_s12  ;;  %1715 = vrot.lane.b32.xlu0 %v5895_v28, %s5349_s12 }
 0x5ee   :  { %1787 = vrot.lane.b32.xlu1 %v5884_v34, %s5350_s22  ;;  %1785 = vrot.lane.b32.xlu0 %v5895_v28, %s5350_s22 }
 0x5f2   :  { %1857 = vrot.lane.b32.xlu1 %v5884_v34, %s5351_s25  ;;  %1855 = vrot.lane.b32.xlu0 %v5895_v28, %s5351_s25 }
 0x5f6   :  { %1927 = vrot.lane.b32.xlu1 %v5884_v34, %s5341_s4  ;;  %1925 = vrot.lane.b32.xlu0 %v5895_v28, %s5341_s4 }
 0x5fa   :  { %1997 = vrot.lane.b32.xlu1 %v5884_v34, %s5352_s19  ;;  %1995 = vrot.lane.b32.xlu0 %v5895_v28, %s5352_s19 }
 0x5fe   :  { %2067 = vrot.lane.b32.xlu1 %v5884_v34, %s5353_s6  ;;  %2065 = vrot.lane.b32.xlu0 %v5895_v28, %s5353_s6 }
 0x602   :  { %2137 = vrot.lane.b32.xlu1 %v5884_v34, %s5354_s5  ;;  %2135 = vrot.lane.b32.xlu0 %v5895_v28, %s5354_s5 }
 0x606   :  { %2207 = vrot.lane.b32.xlu1 %v5884_v34, %s5343_s26  ;;  %2205 = vrot.lane.b32.xlu0 %v5895_v28, %s5343_s26 }
 0x60a   :  { %2347 = vrot.lane.b32.xlu1 %v5884_v34, %s5342_s7  ;;  %2275 = vrot.lane.b32.xlu0 %v5895_v28, %s5346_s8 }
 0x60e   :  { %2345 = vrot.lane.b32.xlu0 %v5895_v28, %s5342_s7  ;;  %1435 = vrot.lane.b32.xlu1 %v5895_v28, %s5347_s20 }
 0x612   :  { %2415 = vrot.lane.b32.xlu0 %v5895_v28, %s5329_s29  ;;  %1575 = vrot.lane.b32.xlu1 %v5895_v28, %s5348_s10 }
 0x64c   :  { %v2278_v15 = vpop.permute.xlu0 %2277  ;;  %v1438_v37 = vpop.permute.xlu1 %1437 }
 0x64d   :  { %2313 = vxpose.xlu0.b32.start.end [1/1] (short) (narrow) %v2278_v15, 8  ;;  %1473 = vxpose.xlu1.b32.start.end [1/1] (short) (narrow) %v1438_v37, 8  ;;  %v5024_v15 = vld [vmem:[%s6245_s11] ss:$12 sps:$4 sm:$0xff]  }
 0x64e   :  { %4592 = vmatpush1.bf16.msra.mxu1 %v5024_v15 }
 0x650   :  { %v2418_v38 = vpop.permute.xlu0 %2417  ;;  %v1508_v39 = vpop.permute.xlu1 %1507 }
 0x651   :  { %2453 = vxpose.xlu0.b32.start.end [1/1] (short) (narrow) %v2418_v38, 8  ;;  %1543 = vxpose.xlu1.b32.start.end [1/1] (short) (narrow) %v1508_v39, 8  ;;  %v5025_v38 = vld [vmem:[%s6245_s11 + $0x1c] ss:$12 sps:$4 sm:$0xff]   ;;  %v5027_v39 = vld [vmem:[%s6245_s11 + $0x18] ss:$12 sps:$4 sm:$0xff]  }
 0x652   :  { %4594 = vmatprep.subr.bf16.mxu1 %v5025_v38 }
 0x653   :  { %4596 = vmatpush1.bf16.msra.mxu1 %v5027_v39 }
 0x654   :  { %v1578_v40 = vpop.permute.xlu1 %1577  ;;  %v1506_v41 = vpop.permute.xlu0 %1505 }
 0x655   :  { %1511 = vxpose.xlu0.b32.start.end [1/1] (short) (narrow) %v1506_v41, 8  ;;  %1613 = vxpose.xlu1.b32.start.end [1/1] (short) (narrow) %v1578_v40, 8  ;;  %v5028_v40 = vld [vmem:[%s6245_s11 + $0x34] ss:$12 sps:$4 sm:$0xff]  }
 0x656   :  { %4598 = vmatprep.subr.bf16.mxu1 %v5028_v40 }
 0x658   :  { %v1648_v42 = vpop.permute.xlu1 %1647  ;;  %v1646_v49 = vpop.permute.xlu0 %1645 }
 0x659   :  { %1683 = vxpose.xlu1.b32.start.end [1/1] (short) (narrow) %v1648_v42, 8  ;;  %v5030_v42 = vld [vmem:[%s6245_s11 + $0x30] ss:$12 sps:$4 sm:$0xff]  }
 0x65a   :  { %4600 = vmatpush1.bf16.msra.mxu1 %v5030_v42 }
 0x65c   :  { %v1718_v43 = vpop.permute.xlu1 %1717  ;;  %v1716_v51 = vpop.permute.xlu0 %1715 }
 0x65d   :  { %1753 = vxpose.xlu1.b32.start.end [1/1] (short) (narrow) %v1718_v43, 8  ;;  %v5031_v43 = vld [vmem:[%s6245_s11 + $0x4c] ss:$12 sps:$4 sm:$0xff]  }
 0x65e   :  { %4602 = vmatprep.subr.bf16.mxu1 %v5031_v43 }
 0x660   :  { %v1788_v44 = vpop.permute.xlu1 %1787  ;;  %v1786_v54 = vpop.permute.xlu0 %1785 }
 0x661   :  { %1823 = vxpose.xlu1.b32.start.end [1/1] (short) (narrow) %v1788_v44, 8 }
 0x664   :  { %v1858_v45 = vpop.permute.xlu1 %1857  ;;  %v1856_v58 = vpop.permute.xlu0 %1855 }
 0x665   :  { %1893 = vxpose.xlu1.b32.start.end [1/1] (short) (narrow) %v1858_v45, 8  ;;  %v5033_v45 = vld [vmem:[%s6245_s11 + $0x48] ss:$12 sps:$4 sm:$0xff]  }
 0x666   :  { %4604 = vmatpush1.bf16.msra.mxu1 %v5033_v45 }
 0x668   :  { %v1928_v46 = vpop.permute.xlu1 %1927  ;;  %v1926_v61 = vpop.permute.xlu0 %1925 }
 0x669   :  { %1963 = vxpose.xlu1.b32.start.end [1/1] (short) (narrow) %v1928_v46, 8 }
 0x66c   :  { %v1998_v47 = vpop.permute.xlu1 %1997  ;;  %v1996_v62 = vpop.permute.xlu0 %1995 }
 0x66d   :  { %2033 = vxpose.xlu1.b32.start.end [1/1] (short) (narrow) %v1998_v47, 8  ;;  %v5034_v47 = vld [vmem:[%s6245_s11 + $0x64] ss:$12 sps:$4 sm:$0xff]  }
 0x66e   :  { %4606 = vmatprep.subr.bf16.mxu1 %v5034_v47 }
 0x670   :  { %v2068_v48 = vpop.permute.xlu1 %2067  ;;  %v2066_v1 = vpop.permute.xlu0 %2065 }
 0x671   :  { %2103 = vxpose.xlu1.b32.start.end [1/1] (short) (narrow) %v2068_v48, 8 }
 0x674   :  { %v2138_v50 = vpop.permute.xlu1 %2137  ;;  %v2136_v2 = vpop.permute.xlu0 %2135 }
 0x675   :  { %2173 = vxpose.xlu1.b32.start.end [1/1] (short) (narrow) %v2138_v50, 8  ;;  %v5037_v50 = vld [vmem:[%s6245_s11 + $0x7c] ss:$12 sps:$4 sm:$0xff]  }
 0x678   :  { %v2208_v52 = vpop.permute.xlu1 %2207  ;;  %v2206_v3 = vpop.permute.xlu0 %2205 }
 0x679   :  { %2243 = vxpose.xlu1.b32.start.end [1/1] (short) (narrow) %v2208_v52, 8  ;;  %v5042_v52 = vld [vmem:[%s6245_s11 + $0x90] ss:$12 sps:$4 sm:$0xff]  }
 0x67c   :  { %v2348_v53 = vpop.permute.xlu1 %2347  ;;  %v2276_v4 = vpop.permute.xlu0 %2275 }
 0x67d   :  { %2383 = vxpose.xlu1.b32.start.end [1/1] (short) (narrow) %v2348_v53, 8  ;;  %v5043_v53 = vld [vmem:[%s6245_s11 + $0xac] ss:$12 sps:$4 sm:$0xff]  }
 0x680   :  { %v1436_v55 = vpop.permute.xlu1 %1435  ;;  %v2346_v5 = vpop.permute.xlu0 %2345 }
 0x681   :  { %1441 = vxpose.xlu1.b32.start.end [1/1] (short) (narrow) %v1436_v55, 8  ;;  %v5046_v55 = vld [vmem:[%s6245_s11 + $0x8] ss:$12 sps:$4 sm:$0xff]  }
 0x682   :  { %4622 = vmatprep.subr.bf16.mxu0 %v5046_v55 }
 0x683   :  { %4624 = vmatpush3.bf16.msra.mxu0 %v5046_v55 }
 0x684   :  { %v1576_v60 = vpop.permute.xlu1 %1575  ;;  %v2416_v6 = vpop.permute.xlu0 %2415 }
 0x685   :  { %1581 = vxpose.xlu0.b32.start.end [1/1] (short) (narrow) %v1576_v60, 8  ;;  %v5048_v60 = vld [vmem:[#allocation13 + $0x4] ss:$12 sps:$4 sm:$0xff]  }
 0x689   :  { %1651 = vxpose.xlu0.b32.start.end [1/1] (short) (narrow) %v1646_v49, 8  ;;  %v5036_v49 = vld [vmem:[%s6245_s11 + $0x60] ss:$12 sps:$4 sm:$0xff]  }
 0x68a   :  { %4608 = vmatpush1.bf16.msra.mxu1 %v5036_v49 }
 0x68b   :  { %4610 = vmatprep.subr.bf16.mxu1 %v5037_v50 }
 0x68d   :  { %1721 = vxpose.xlu0.b32.start.end [1/1] (short) (narrow) %v1716_v51, 8  ;;  %v5040_v51 = vld [vmem:[%s6245_s11 + $0x94] ss:$12 sps:$4 sm:$0xff]  }
 0x691   :  { %1791 = vxpose.xlu0.b32.start.end [1/1] (short) (narrow) %v1786_v54, 8  ;;  %v5045_v54 = vld [vmem:[%s6245_s11 + $0xa8] ss:$12 sps:$4 sm:$0xff]  }
 0x695   :  { %1861 = vxpose.xlu0.b32.start.end [1/1] (short) (narrow) %v1856_v58, 8  ;;  %v5047_v58 = vld [vmem:[%s6245_s11 + $0x20] ss:$12 sps:$4 sm:$0xff]  }
 0x696   :  { %4626 = vmatprep.subr.bf16.mxu0 %v5047_v58 }
 0x697   :  { %4628 = vmatpush3.bf16.msra.mxu0 %v5047_v58  ;;  %v5052_v58 = vld [vmem:[#allocation13 + $0x1c] ss:$12 sps:$4 sm:$0xff]  }
 0x699   :  { %1931 = vxpose.xlu0.b32.start.end [1/1] (short) (narrow) %v1926_v61, 8  ;;  %v5051_v61 = vld [vmem:[%s6245_s11 + $0x38] ss:$12 sps:$4 sm:$0xff]  }
 0x69a   :  { %4630 = vmatprep.subr.bf16.mxu0 %v5051_v61 }
 0x69b   :  { %4632 = vmatpush3.bf16.msra.mxu0 %v5051_v61  ;;  %v5056_v61 = vld [vmem:[#allocation13 + $0x34] ss:$12 sps:$4 sm:$0xff]  }
 0x69d   :  { %2001 = vxpose.xlu0.b32.start.end [1/1] (short) (narrow) %v1996_v62, 8  ;;  %v5055_v62 = vld [vmem:[%s6245_s11 + $0x50] ss:$12 sps:$4 sm:$0xff]  }
 0x69e   :  { %4634 = vmatprep.subr.bf16.mxu0 %v5055_v62 }
 0x69f   :  { %4636 = vmatpush3.bf16.msra.mxu0 %v5055_v62  ;;  %v5058_v62 = vld [vmem:[#allocation13 + $0x30] ss:$12 sps:$4 sm:$0xff]  }
 0x6a1   :  { %2071 = vxpose.xlu0.b32.start.end [1/1] (short) (narrow) %v2066_v1, 8  ;;  %v5059_v1 = vld [vmem:[%s6245_s11 + $0x68] ss:$12 sps:$4 sm:$0xff]  }
 0x6a2   :  { %4638 = vmatprep.subr.bf16.mxu0 %v5059_v1 }
 0x6a3   :  { %4640 = vmatpush3.bf16.msra.mxu0 %v5059_v1  ;;  %v5060_v1 = vld [vmem:[#allocation13 + $0x4c] ss:$12 sps:$4 sm:$0xff]  }
 0x6a5   :  { %2141 = vxpose.xlu0.b32.start.end [1/1] (short) (narrow) %v2136_v2, 8 }
 0x6a9   :  { %2211 = vxpose.xlu0.b32.start.end [1/1] (short) (narrow) %v2206_v3, 8  ;;  %v5063_v3 = vld [vmem:[%s6245_s11 + $0x80] ss:$12 sps:$4 sm:$0xff]  }
 0x6aa   :  { %4642 = vmatprep.subr.bf16.mxu0 %v5063_v3 }
 0x6ab   :  { %4644 = vmatpush3.bf16.msra.mxu0 %v5063_v3  ;;  %v5062_v3 = vld [vmem:[#allocation13 + $0x48] ss:$12 sps:$4 sm:$0xff]  }
 0x6ad   :  { %2281 = vxpose.xlu0.b32.start.end [1/1] (short) (narrow) %v2276_v4, 8 }
 0x6b1   :  { %2351 = vxpose.xlu0.b32.start.end [1/1] (short) (narrow) %v2346_v5, 8  ;;  %v5071_v5 = vld [vmem:[%s6245_s11 + $0xb0] ss:$12 sps:$4 sm:$0xff]  }
 0x6b5   :  { %2421 = vxpose.xlu0.b32.start.end [1/1] (short) (narrow) %v2416_v6, 8  ;;  %v6057_v6 = vld [vmem:[#allocation13 + $0x8] ss:$12 sps:$4 sm:$0xff]  }
 0x6cd   :  { %v1489_v7 = vpop.trf.xlu1  ;;  %v2329_v11 = vpop.trf.xlu0 }
 0x6ce   :  { %2489 = vrot.lane.b32.xlu1 %v1489_v7, %s5329_s29 }
 0x6d1   :  { %v1559_v8 = vpop.trf.xlu1  ;;  %v2469_v14 = vpop.trf.xlu0 }
 0x6d2   :  { %2497 = vrot.lane.b32.xlu1 %v1559_v8, %s5342_s7 }
 0x6d5   :  { %v1629_v10 = vpop.trf.xlu1  ;;  %v1527_v17 = vpop.trf.xlu0 }
 0x6d6   :  { %2505 = vrot.lane.b32.xlu1 %v1629_v10, %s5346_s8 }
 0x6d9   :  { %v1699_v12 = vpop.trf.xlu1 }
 0x6da   :  { %2513 = vrot.lane.b32.xlu1 %v1699_v12, %s5343_s26 }
 0x6dd   :  { %v1769_v13 = vpop.trf.xlu1 }
 0x6de   :  { %2521 = vrot.lane.b32.xlu1 %v1769_v13, %s5354_s5  ;;  %2585 = vrot.lane.b32.xlu0 %v2329_v11, %s5348_s10 }
 0x6e1   :  { %v1839_v16 = vpop.trf.xlu1 }
 0x6e2   :  { %2529 = vrot.lane.b32.xlu1 %v1839_v16, %s5353_s6  ;;  %2601 = vrot.lane.b32.xlu0 %v2469_v14, %s5347_s20 }
 0x6e5   :  { %v1909_v18 = vpop.trf.xlu1 }
 0x6e6   :  { %2537 = vrot.lane.b32.xlu1 %v1909_v18, %s5352_s19  ;;  %2495 = vrot.lane.b32.xlu0 %v1527_v17, %s5342_s7 }
 0x6e9   :  { %v1979_v19 = vpop.trf.xlu1 }
 0x6ea   :  { %2545 = vrot.lane.b32.xlu1 %v1979_v19, %s5341_s4 }
 0x6ed   :  { %v2049_v20 = vpop.trf.xlu1 }
 0x6ee   :  { %2553 = vrot.lane.b32.xlu1 %v2049_v20, %s5351_s25 }
 0x6f1   :  { %v2119_v21 = vpop.trf.xlu1 }
 0x6f2   :  { %2561 = vrot.lane.b32.xlu1 %v2119_v21, %s5350_s22 }
 0x6f5   :  { %v2189_v22 = vpop.trf.xlu1 }
 0x6f6   :  { %2569 = vrot.lane.b32.xlu1 %v2189_v22, %s5349_s12 }
 0x6f9   :  { %v2259_v23 = vpop.trf.xlu1 }
 0x6fa   :  { %2577 = vrot.lane.b32.xlu1 %v2259_v23, %s5345_s16 }
 0x6fd   :  { %v2399_v24 = vpop.trf.xlu1 }
 0x6fe   :  { %2593 = vrot.lane.b32.xlu1 %v2399_v24, %s5344_s27 }
 0x701   :  { %v1457_v25 = vpop.trf.xlu1 }
 0x702   :  { %2487 = vrot.lane.b32.xlu1 %v1457_v25, %s5329_s29 }
 0x705   :  { %v1597_v26 = vpop.trf.xlu0 }
 0x706   :  { %2503 = vrot.lane.b32.xlu1 %v1597_v26, %s5346_s8 }
 0x709   :  { %v1667_v27 = vpop.trf.xlu0 }
 0x70a   :  { %2511 = vrot.lane.b32.xlu1 %v1667_v27, %s5343_s26 }
 0x70d   :  { %v1737_v29 = vpop.trf.xlu0 }
 0x70e   :  { %2519 = vrot.lane.b32.xlu0 %v1737_v29, %s5354_s5 }
 0x711   :  { %v1807_v30 = vpop.trf.xlu0 }
 0x712   :  { %2527 = vrot.lane.b32.xlu0 %v1807_v30, %s5353_s6 }
 0x715   :  { %v1877_v31 = vpop.trf.xlu0 }
 0x716   :  { %2535 = vrot.lane.b32.xlu0 %v1877_v31, %s5352_s19 }
 0x719   :  { %v1947_v32 = vpop.trf.xlu0 }
 0x71a   :  { %2543 = vrot.lane.b32.xlu0 %v1947_v32, %s5341_s4 }
 0x71d   :  { %v2017_v33 = vpop.trf.xlu0 }
 0x71e   :  { %2551 = vrot.lane.b32.xlu0 %v2017_v33, %s5351_s25 }
 0x721   :  { %v2087_v35 = vpop.trf.xlu0 }
 0x722   :  { %2559 = vrot.lane.b32.xlu0 %v2087_v35, %s5350_s22 }
 0x725   :  { %v2157_v37 = vpop.trf.xlu0 }
 0x726   :  { %2567 = vrot.lane.b32.xlu0 %v2157_v37, %s5349_s12 }
 0x729   :  { %v2227_v41 = vpop.trf.xlu0 }
 0x72a   :  { %2575 = vrot.lane.b32.xlu0 %v2227_v41, %s5345_s16 }
 0x72d   :  { %v2297_v44 = vpop.trf.xlu0 }
 0x72e   :  { %2583 = vrot.lane.b32.xlu0 %v2297_v44, %s5348_s10 }
 0x731   :  { %v2367_v46 = vpop.trf.xlu0 }
 0x732   :  { %2591 = vrot.lane.b32.xlu0 %v2367_v46, %s5344_s27 }
 0x733   :  { %1369 = vxpose.xlu1.b32.start.end [1/1] (short) (narrow) %v5895_v28, 8  ;;  %v5039_v28 = vld [vmem:[%s6245_s11 + $0x78] ss:$12 sps:$4 sm:$0xff]  }
 0x734   :  { %4612 = vmatpush1.bf16.msra.mxu1 %v5039_v28  ;;  %v2647_v28 = vld [vmem:[#allocation4] sm:$0xff] }
 0x735   :  { %v2437_v48 = vpop.trf.xlu0  ;;  %4614 = vmatprep.subr.bf16.mxu1 %v5040_v51 }
 0x736   :  { %2599 = vrot.lane.b32.xlu0 %v2437_v48, %s5347_s20 }
 0x738   :  { %4616 = vmatpush1.bf16.msra.mxu1 %v5042_v52 }
 0x739   :  { %4618 = vmatprep.subr.bf16.mxu1 %v5043_v53 }
 0x73c   :  { %4620 = vmatpush1.bf16.msra.mxu1 %v5045_v54  ;;  %v5050_v54 = vld [vmem:[#allocation13] ss:$12 sps:$4 sm:$0xff]  }
 0x73d   :  { %4654 = vmatprep.subr.bf16.mxu1 %v5048_v60  ;;  %v5054_v60 = vld [vmem:[#allocation13 + $0x18] ss:$12 sps:$4 sm:$0xff]  }
 0x740   :  { %v6044_v2 = vpop.permute.xlu1 %2489 }
 0x744   :  { %v6049_v4 = vpop.permute.xlu1 %2497 }
 0x748   :  { %v6059_v7 = vpop.permute.xlu1 %2505 }
 0x74c   :  { %v6062_v8 = vpop.permute.xlu1 %2513 }
 0x750   :  { %v6064_v10 = vpop.permute.xlu1 %2521  ;;  %v6068_v12 = vpop.permute.xlu0 %2585 }
 0x754   :  { %1401 = vxpose.xlu0.b32.start.end [1/1] (short) (narrow) %v5884_v34, 8  ;;  %v5067_v34 = vld [vmem:[%s6245_s11 + $0x98] ss:$12 sps:$4 sm:$0xff]   ;;  %v6066_v11 = vpop.permute.xlu1 %2529  ;;  %v6072_v14 = vpop.permute.xlu0 %2601 }
 0x755   :  { %4646 = vmatprep.subr.bf16.mxu0 %v5067_v34 }
 0x756   :  { %4648 = vmatpush3.bf16.msra.mxu0 %v5067_v34  ;;  %v5064_v34 = vld [vmem:[#allocation13 + $0x64] ss:$12 sps:$4 sm:$0xff]  }
 0x757   :  { %4650 = vmatprep.subr.bf16.mxu0 %v5071_v5 }
 0x758   :  { %v6070_v13 = vpop.permute.xlu1 %2537  ;;  %v2496_v17 = vpop.permute.xlu0 %2495 }
 0x75a   :  { %4652 = vmatpush3.bf16.msra.mxu0 %v5071_v5  ;;  %v5066_v5 = vld [vmem:[#allocation13 + $0x60] ss:$12 sps:$4 sm:$0xff]  }
 0x75b   :  { %4686 = vmatprep.subr.bf16.mxu0 %v6057_v6 }
 0x75c   :  { %v6074_v16 = vpop.permute.xlu1 %2545 }
 0x760   :  { %v6076_v18 = vpop.permute.xlu1 %2553 }
 0x764   :  { %v6078_v20 = vpop.permute.xlu1 %2561 }
 0x768   :  { %v6080_v22 = vpop.permute.xlu1 %2569 }
 0x76c   :  { %v6082_v24 = vpop.permute.xlu1 %2577 }
 0x770   :  { %v6084_v26 = vpop.permute.xlu1 %2593 }
 0x774   :  { %v2488_v29 = vpop.permute.xlu1 %2487 }
 0x778   :  { %v2504_v31 = vpop.permute.xlu1 %2503 }
 0x77c   :  { %v2512_v33 = vpop.permute.xlu1 %2511 }
 0x780   :  { %v2520_v19 = vpop.permute.xlu0 %2519 }
 0x784   :  { %v2528_v21 = vpop.permute.xlu0 %2527 }
 0x788   :  { %v2536_v23 = vpop.permute.xlu0 %2535 }
 0x78c   :  { %v2544_v25 = vpop.permute.xlu0 %2543 }
 0x790   :  { %v2552_v27 = vpop.permute.xlu0 %2551 }
 0x794   :  { %v2560_v30 = vpop.permute.xlu0 %2559 }
 0x798   :  { %v2568_v32 = vpop.permute.xlu0 %2567 }
 0x79c   :  { %v2576_v35 = vpop.permute.xlu0 %2575 }
 0x7a0   :  { %v2584_v37 = vpop.permute.xlu0 %2583 }
 0x7a4   :  { %v2592_v44 = vpop.permute.xlu0 %2591 }
 0x7a8   :  { %v2600_v51 = vpop.permute.xlu0 %2599 }
 0x7b3   :  { %v1385_v36 = vpop.trf.xlu1 }
 0x7b4   :  { %v2606_v15 = vsel %vm2605_vm8, %v1385_v36, %v2488_v29  ;;  %v5072_v29 = vld [vmem:[#allocation13 + $0x94] ss:$12 sps:$4 sm:$0xff]  }
 0x7b5   :  { %v2608_v38 = vsel %vm1001_vm2, %v2606_v15, %v2496_v17  ;;  %v5068_v17 = vld [vmem:[#allocation13 + $0x7c] ss:$12 sps:$4 sm:$0xff]   ;;  %v2648_v15 = vld [vmem:[#allocation4 + $0x8] sm:$0xff] }
 0x7b6   :  { %v2611_v39 = vsel %vm2610_vm9, %v2608_v38, %v2504_v31 }
 0x7b7   :  { %v2613_v40 = vsel %vm1004_vm3, %v2611_v39, %v2512_v33  ;;  %v5076_v33 = vld [vmem:[#allocation13 + $0xac] ss:$12 sps:$4 sm:$0xff]  }
 0x7b8   :  { %v2616_v41 = vsel %vm2615_vm10, %v2613_v40, %v2520_v19 }
 0x7b9   :  { %v2619_v42 = vsel %vm2618_vm11, %v2616_v41, %v2528_v21 }
 0x7ba   :  { %v2622_v43 = vsel %vm2621_vm12, %v2619_v42, %v2536_v23 }
 0x7bb   :  { %v2624_v45 = vsel %vm723_vm0, %v2622_v43, %v2544_v25  ;;  %v5070_v25 = vld [vmem:[#allocation13 + $0x78] ss:$12 sps:$4 sm:$0xff]  }
 0x7bc   :  { %v2627_v46 = vsel %vm2626_vm13, %v2624_v45, %v2552_v27 }
 0x7bd   :  { %v2630_v47 = vsel %vm2629_vm14, %v2627_v46, %v2560_v30 }
 0x7be   :  { %v2633_v48 = vsel %vm2632_vm15, %v2630_v47, %v2568_v32 }
 0x7bf   :  { %v2636_v49 = vsel %vm2635_vm4, %v2633_v48, %v2576_v35 }
 0x7c0   :  { %v2639_v50 = vsel %vm2638_vm5, %v2636_v49, %v2584_v37  ;;  %v5079_v37 = vld [vmem:[#allocation13 + $0x20] ss:$12 sps:$4 sm:$0xff]  }
 0x7c1   :  { %v2642_v52 = vsel %vm2641_vm6, %v2639_v50, %v2592_v44 }
 0x7c2   :  { %v6101_v53 = vsel %vm2644_vm7, %v2642_v52, %v2600_v51 }
 0x7c3   :  { %v2848_v55 = vadd.f32 %v2647_v28, %v6101_v53 }
 0x7c5   :  { %2931 = vmatmul.mubr.f32.vlgmr.msra.gmra.mrb[10].mxu1 %v2848_v55  ;;  %4284 = vmatprep.mubr.f32.mxu0 %v2848_v55 }
 0x7c6   :  { %4656 = vmatpush1.bf16.msra.mxu1 %v5050_v54  ;;  %2936 = vmatprep.mubr.f32.mxu1 %v5340_v0 }
 0x7c7   :  { %4658 = vmatprep.subr.bf16.mxu1 %v5052_v58 }
 0x7ca   :  { %4660 = vmatpush1.bf16.msra.mxu1 %v5054_v60 }
 0x7cb   :  { %4662 = vmatprep.subr.bf16.mxu1 %v5056_v61 }
 0x7ce   :  { %4664 = vmatpush1.bf16.msra.mxu1 %v5058_v62 }
 0x7cf   :  { %4666 = vmatprep.subr.bf16.mxu1 %v5060_v1 }
 0x7d2   :  { %4668 = vmatpush1.bf16.msra.mxu1 %v5062_v3 }
 0x7d3   :  { %4670 = vmatprep.subr.bf16.mxu1 %v5064_v34 }
 0x7d4   :  { %v1417_v19 = vpop.trf.xlu0 }
 0x7d5   :  { %v2607_v21 = vsel %vm2605_vm8, %v1417_v19, %v6044_v2  ;;  %v5074_v2 = vld [vmem:[#allocation13 + $0x90] ss:$12 sps:$4 sm:$0xff]  }
 0x7d6   :  { %v2609_v23 = vsel %vm1001_vm2, %v2607_v21, %v6049_v4  ;;  %4672 = vmatpush1.bf16.msra.mxu1 %v5066_v5 }
 0x7d7   :  { %v2612_v27 = vsel %vm2610_vm9, %v2609_v23, %v6059_v7  ;;  %4674 = vmatprep.subr.bf16.mxu1 %v5068_v17 }
 0x7d8   :  { %v2614_v30 = vsel %vm1004_vm3, %v2612_v27, %v6062_v8 }
 0x7d9   :  { %v2617_v31 = vsel %vm2615_vm10, %v2614_v30, %v6064_v10  ;;  %v5078_v10 = vld [vmem:[#allocation13 + $0xa8] ss:$12 sps:$4 sm:$0xff]  }
 0x7da   :  { %v2620_v32 = vsel %vm2618_vm11, %v2617_v31, %v6066_v11  ;;  %4676 = vmatpush1.bf16.msra.mxu1 %v5070_v25 }
 0x7db   :  { %v2623_v4 = vsel %vm2621_vm12, %v2620_v32, %v6070_v13  ;;  %4678 = vmatprep.subr.bf16.mxu1 %v5072_v29 }
 0x7dc   :  { %v2625_v7 = vsel %vm723_vm0, %v2623_v4, %v6074_v16 }
 0x7dd   :  { %v2628_v35 = vsel %vm2626_vm13, %v2625_v7, %v6076_v18 }
 0x7de   :  { %4680 = vmatpush1.bf16.msra.mxu1 %v5074_v2  ;;  %v2631_v8 = vsel %vm2629_vm14, %v2628_v35, %v6078_v20 }
 0x7df   :  { %v2634_v11 = vsel %vm2632_vm15, %v2631_v8, %v6080_v22  ;;  %4682 = vmatprep.subr.bf16.mxu1 %v5076_v33  ;;  %v5082_v22 = vld [vmem:[#allocation13 + $0x68] ss:$12 sps:$4 sm:$0xff]  }
 0x7e0   :  { %v2637_v13 = vsel %vm2635_vm4, %v2634_v11, %v6082_v24  ;;  %v5084_v24 = vld [vmem:[#allocation13 + $0x98] ss:$12 sps:$4 sm:$0xff]  }
 0x7e1   :  { %v2640_v36 = vsel %vm2638_vm5, %v2637_v13, %v6068_v12  ;;  %v5080_v12 = vld [vmem:[#allocation13 + $0x38] ss:$12 sps:$4 sm:$0xff]  }
 0x7e2   :  { %v2643_v16 = vsel %vm2641_vm6, %v2640_v36, %v6084_v26  ;;  %4684 = vmatpush1.bf16.msra.mxu1 %v5078_v10  ;;  %v5085_v26 = vld [vmem:[#allocation13 + $0xb0] ss:$12 sps:$4 sm:$0xff]  }
 0x7e3   :  { %v6135_v18 = vsel %vm2644_vm7, %v2643_v16, %v6072_v14  ;;  %v5081_v14 = vld [vmem:[#allocation13 + $0x50] ss:$12 sps:$4 sm:$0xff]   ;;  %v2731_v16 = vld [vmem:[#allocation10 + $0x8] sm:$0xff] }
 0x7e4   :  { %v2849_v20 = vadd.f32 %v2648_v15, %v6135_v18  ;;  %v2733_v13 = vld [vmem:[#allocation12 + $0x8] sm:$0xff]  ;;  %v2732_v36 = vld [vmem:[#allocation12] sm:$0xff] }
 0x7e6   :  { %2937 = vmatmul.mubr.f32.gmra.mrb[12].mxu1 %v2849_v20  ;;  %4285 = vmatmul.mubr.f32.vlgmr.msra.gmra.mrb[12].mxu0 %v2849_v20 }
 0x7e7   :  { %4688 = vmatpush3.bf16.msra.mxu0 %v6057_v6  ;;  %4319 = vmatprep.mubr.f32.mxu0 %v6101_v53  ;;  %v5083_v6 = vld [vmem:[#allocation13 + $0x80] ss:$12 sps:$4 sm:$0xff]  }
 0x7e8   :  { %3082 = vmatprep.mubr.f32.mxu1 %v5340_v0  ;;  %4690 = vmatprep.subr.bf16.mxu0 %v5079_v37 }
 0x7ea   :  { %3083 = vmatmul.mubr.f32.vlgmr.msra.gmra.mrb[14].mxu1 %v6101_v53 }
 0x7eb   :  { %4692 = vmatpush3.bf16.msra.mxu0 %v5079_v37  ;;  %3088 = vmatprep.mubr.f32.mxu1 %v5340_v0  ;;  %v2729_v0 = vld [vmem:[#allocation9] sm:$0x7] }
 0x7ec   :  { %4694 = vmatprep.subr.bf16.mxu0 %v5080_v12  ;;  %v2858_v38 = vrot.slane %v2729_v0, %v404_v59  ;;  %v2854_v42 = vrot.slane %v2729_v0, %v400_v57  ;;  %v2862_v49 = vrot.slane %v2729_v0, %v408_v63  ;;  %v3943_v0 = vld [vmem:[%s6251_s17 + $0x10] sm:$0xff]  }
 0x7ee   :  { %3089 = vmatmul.mubr.f32.gmra.mrb[16].mxu1 %v6135_v18 }
 0x7ef   :  { %4696 = vmatpush3.bf16.msra.mxu0 %v5080_v12  ;;  %v2730_v12 = vld [vmem:[#allocation10] sm:$0xff] }
 0x7f0   :  { %4698 = vmatprep.subr.bf16.mxu0 %v5081_v14 }
 0x7f3   :  { %4700 = vmatpush3.bf16.msra.mxu0 %v5081_v14 }
 0x7f4   :  { %4702 = vmatprep.subr.bf16.mxu0 %v5082_v22 }
 0x7f7   :  { %4704 = vmatpush3.bf16.msra.mxu0 %v5082_v22  ;;  %v3904_v22 = vld [vmem:[%s6251_s17] sm:$0xff]  }
 0x7f8   :  { %4706 = vmatprep.subr.bf16.mxu0 %v5083_v6 }
 0x7fb   :  { %4708 = vmatpush3.bf16.msra.mxu0 %v5083_v6  ;;  %v3942_v6 = vld [vmem:[%s6251_s17 + $0x8] sm:$0xff]  }
 0x7fc   :  { %4710 = vmatprep.subr.bf16.mxu0 %v5084_v24 }
 0x7ff   :  { %4712 = vmatpush3.bf16.msra.mxu0 %v5084_v24 }
 0x800   :  { %4714 = vmatprep.subr.bf16.mxu0 %v5085_v26 }
 0x803   :  { %4716 = vmatpush3.bf16.msra.mxu0 %v5085_v26 }
 0x804   :  { %4748 = vmatprep.subr.bf16.mxu0 %v3904_v22 }
 0x806   :  { %4320 = vmatmul.mubr.f32.vlgmr.msra.gmra.mrb[14].mxu0 %v6135_v18 }
 0x807   :  { %4750 = vmatpush3.bf16.msra.mxu0 %v3904_v22 }
 0x808   :  { %4752 = vmatprep.subr.bf16.mxu0 %v3942_v6 }
 0x80b   :  { %4754 = vmatpush3.bf16.msra.mxu0 %v3942_v6 }
 0x80c   :  { %4756 = vmatprep.subr.bf16.mxu0 %v3943_v0 }
 0x80f   :  { %4758 = vmatpush3.bf16.msra.mxu0 %v3943_v0 }
 0x898   :  { %v2932_v39 = vpop.f32.mrb[10].mxu1 }
 0x899   :  { %v2934_v40 = vpop.f32.mrb[11].mxu1  ;;  %v2933_v45 = vadd.f32 %v2932_v39, %v2854_v42  ;;  %v3945_v39 = vld [vmem:[%s6251_s17 + $0x20] sm:$0xff]  }
 0x89a   :  { %v2935_v41 = vadd.f32 %v2934_v40, %v2858_v38  ;;  %v3946_v40 = vld [vmem:[%s6251_s17 + $0x28] sm:$0xff]  }
 0x89c   :  { %3172 = vrot.lane.b32.xlu1 %v2935_v41, %s5341_s4 }
 0x8b9   :  { %v2938_v43 = vpop.f32.mrb[12].mxu1  ;;  %v4286_v44 = vpop.f32.mrb[12].mxu0 }
 0x8ba   :  { %v2939_v46 = vadd.f32 %v2938_v43, %v2854_v42  ;;  %v2940_v47 = vpop.f32.mrb[13].mxu1  ;;  %v3009_v48 = vpop.f32.mrb[13].mxu0  ;;  %v3015_v57 = vadd.f32 %v4286_v44, %v2862_v49 }
 0x8bb   :  { %v2941_v50 = vadd.f32 %v2940_v47, %v2858_v38  ;;  %v3010_v55 = vadd.f32 %v3009_v48, %v2862_v49  ;;  %v3944_v38 = vld [vmem:[%s6251_s17 + $0x18] sm:$0xff]   ;;  %v3865_v47 = vld [vmem:[#allocation15] ss:$0 sm:$0xff] }
 0x8bc   :  { %v4953_v28 = vpack.i.bf16 %v2939_v46, %v2933_v45  ;;  %v4717_v59 = vpack.c.bf16 %v2939_v46, %v2933_v45  ;;  %4760 = vmatprep.subr.bf16.mxu0 %v3944_v38  ;;  %v3947_v45 = vld [vmem:[%s6251_s17 + $0x30] sm:$0xff]   ;;  %v3948_v46 = vld [vmem:[%s6251_s17 + $0x38] sm:$0xff]  }
 0x8bd   :  { %v4729_v51 = vpack.c.bf16 %v2941_v50, %v2935_v41  ;;  %v3084_v52 = vpop.f32.mrb[14].mxu1  ;;  %3174 = vrot.lane.b32.xlu1 %v2941_v50, %s5341_s4  ;;  %4762 = vmatpush3.bf16.msra.mxu0 %v3944_v38 }
 0x8be   :  { %v3086_v54 = vpop.f32.mrb[15].mxu1  ;;  %4954 = vrot.lane.b32.xlu0 %v4953_v28, %s5341_s4  ;;  %4719 = vmatprep.subr.msk.bf16.mxu1 %vm5801_vm1, %v4717_v59 }
 0x8bf   :  { %4722 = vmatpush3.bf16.xpose.msk.msra.mxu1 %vm5801_vm1, %v4717_v59  ;;  %4764 = vmatprep.subr.bf16.mxu0 %v3945_v39 }
 0x8c1   :  { %v3090_v56 = vpop.f32.mrb[16].mxu1  ;;  %3352 = vrot.lane.b32.xlu1 %v3015_v57, %s5341_s4  ;;  %4766 = vmatpush3.bf16.msra.mxu0 %v3945_v39 }
 0x8c2   :  { %v4735_v63 = vpack.c.bf16 %v3090_v56, %v3084_v52  ;;  %v3092_v58 = vpop.f32.mrb[17].mxu1  ;;  %3350 = vrot.lane.b32.xlu0 %v3010_v55, %s5341_s4  ;;  %4768 = vmatprep.subr.bf16.mxu0 %v3946_v40  ;;  %v3870_v56 = vld [vmem:[#allocation16] ss:$0 sm:$0xff] }
 0x8c3   :  { %v6160_v60 = vpack.c.bf16 %v3092_v58, %v3086_v54 }
 0x8c5   :  { %4770 = vmatpush3.bf16.msra.mxu0 %v3946_v40 }
 0x8c6   :  { %4772 = vmatprep.subr.bf16.mxu0 %v3947_v45 }
 0x8c9   :  { %4774 = vmatpush3.bf16.msra.mxu0 %v3947_v45 }
 0x8ca   :  { %4776 = vmatprep.subr.bf16.mxu0 %v3948_v46 }
 0x8cd   :  { %4778 = vmatpush3.bf16.msra.mxu0 %v3948_v46 }
 0x8d9   :  { %v4321_v61 = vpop.f32.mrb[14].mxu0 }
 0x8da   :  { %v3161_v62 = vpop.f32.mrb[15].mxu0 }
 0x8db   :  { %v6162_v1 = vpack.c.bf16 %v4321_v61, %v3161_v62 }
 0x90e   :  { %v3173_v3 = vpop.permute.xlu1 %3172 }
 0x90f   :  { %4326 = vmatprep.mubr.msk.f32.mxu1 %vm723_vm0, %v3173_v3 }
 0x92f   :  { %v3175_v34 = vpop.permute.xlu1 %3174 }
 0x930   :  { %v4955_v5 = vpop.permute.xlu0 %4954  ;;  %4327 = vmatmul.mubr.msk.f32.vlgmr.msra.gmra.mrb[18].mxu1 %vm723_vm0, %v3175_v34 }
 0x931   :  { %v4957_v17 = vunpack.i.h.bf16 %v4955_v5  ;;  %v4956_v19 = vunpack.i.l.bf16 %v4955_v5  ;;  %4333 = vmatprep.mubr.msk.f32.mxu1 %vm723_vm0, %v3010_v55 }
 0x933   :  { %v4723_v21 = vpack.c.bf16 %v4957_v17, %v4956_v19  ;;  %v3353_v25 = vpop.permute.xlu1 %3352 }
 0x934   :  { %v3351_v23 = vpop.permute.xlu0 %3350 }
 0x935   :  { %4725 = vmatprep.subr.msk.bf16.mxu1 %vm5801_vm1, %v4723_v21 }
 0x936   :  { %4728 = vmatpush3.bf16.xpose.msk.msra.mxu1 %vm5801_vm1, %v4723_v21 }
 0x937   :  { %4731 = vmatprep.subr.msk.bf16.mxu1 %vm5801_vm1, %v4729_v51 }
 0x93d   :  { %4334 = vmatmul.mubr.msk.f32.vlgmr.msra.gmra.mrb[20].mxu1 %vm723_vm0, %v3015_v57 }
 0x93e   :  { %4734 = vmatpush3.bf16.xpose.msk.msra.mxu1 %vm5801_vm1, %v4729_v51  ;;  %4340 = vmatprep.mubr.msk.f32.mxu1 %vm723_vm0, %v3351_v23 }
 0x93f   :  { %4736 = vmatprep.subr.bf16.mxu1 %v4735_v63 }
 0x945   :  { %4341 = vmatmul.mubr.msk.f32.vlgmr.msra.gmra.mrb[22].mxu1 %vm723_vm0, %v3353_v25 }
 0x946   :  { %4738 = vmatpush3.bf16.msra.mxu1 %v4735_v63 }
 0x947   :  { %4740 = vmatprep.subr.bf16.mxu1 %v6160_v60 }
 0xa03   :  { %v4328_v27 = vpop.f32.mrb[18].mxu1 }
 0xa04   :  { %v3252_v29 = vpop.f32.mrb[19].mxu1 }
 0xa10   :  { %v4335_v30 = vpop.f32.mrb[20].mxu1 }
 0xa11   :  { %3441 = vrot.lane.b32.xlu1 %v4335_v30, %s5342_s7  ;;  %v3341_v31 = vpop.f32.mrb[21].mxu1 }
 0xa12   :  { %3439 = vrot.lane.b32.xlu0 %v3341_v31, %s5342_s7 }
 0xa18   :  { %v4342_v32 = vpop.f32.mrb[22].mxu1 }
 0xa19   :  { %3449 = vrot.lane.b32.xlu1 %v4342_v32, %s5343_s26  ;;  %v3428_v9 = vpop.f32.mrb[23].mxu1 }
 0xa1a   :  { %3447 = vrot.lane.b32.xlu0 %v3428_v9, %s5343_s26 }
 0xa83   :  { %v3442_v2 = vpop.permute.xlu1 %3441 }
 0xa84   :  { %v3440_v4 = vpop.permute.xlu0 %3439  ;;  %v3454_v33 = vsel %vm1001_vm2, %v4328_v27, %v3442_v2 }
 0xa85   :  { %v3453_v35 = vsel %vm1001_vm2, %v3252_v29, %v3440_v4 }
 0xa8b   :  { %v3450_v7 = vpop.permute.xlu1 %3449 }
 0xa8c   :  { %v3456_v8 = vsel %vm1004_vm3, %v3454_v33, %v3450_v7  ;;  %v3448_v10 = vpop.permute.xlu0 %3447 }
 0xa8d   :  { %5090 = vtanh.f32 %v3456_v8  ;;  %v3455_v11 = vsel %vm1004_vm3, %v3453_v35, %v3448_v10 }
 0xa8e   :  { %5092 = vtanh.f32 %v3455_v11 }
 0xa97   :  { %v5091_v15 = vpop.eup %5090 }
 0xa98   :  { %v5093_v20 = vpop.eup %5092  ;;  %v3460_v37 = vmul.f32 %v5091_v15, %v2733_v13 }
 0xa99   :  { %v3459_v14 = vmul.f32 %v5093_v20, %v2732_v36 }
 0xa9a   :  { %v3462_v24 = vadd.f32 %v3460_v37, %v2731_v16 }
 0xa9b   :  { %v3461_v26 = vadd.f32 %v3459_v14, %v2730_v12 }
 0xa9c   :  { %3554 = vrot.lane.b32.xlu1 %v3462_v24, %s5344_s27 }
 0xa9d   :  { %3552 = vrot.lane.b32.xlu0 %v3461_v26, %s5344_s27  ;;  %4347 = vmatprep.mubr.msk.f32.mxu1 %vm1001_vm2, %v3461_v26 }
 0xa9e   :  { %4348 = vmatmul.mubr.msk.f32.vlgmr.msra.gmra.mrb[24].mxu1 %vm1001_vm2, %v3462_v24 }
 0xa9f   :  { %4742 = vmatpush3.bf16.msra.mxu1 %v6160_v60 }
 0xaa0   :  { %4744 = vmatprep.subr.bf16.mxu1 %v6162_v1  ;;  %3639 = vrot.lane.b32.xlu1 %v3462_v24, %s5345_s16 }
 0xaa1   :  { %3637 = vrot.lane.b32.xlu0 %v3461_v26, %s5345_s16 }
 0xb0e   :  { %v3555_v42 = vpop.permute.xlu1 %3554 }
 0xb0f   :  { %v3553_v41 = vpop.permute.xlu0 %3552 }
 0xb10   :  { %4354 = vmatprep.mubr.msk.f32.mxu1 %vm1001_vm2, %v3553_v41 }
 0xb11   :  { %4355 = vmatmul.mubr.msk.f32.vlgmr.msra.gmra.mrb[24].mxu1 %vm1001_vm2, %v3555_v42 }
 0xb12   :  { %4746 = vmatpush3.bf16.msra.mxu1 %v6162_v1  ;;  %v3640_v44 = vpop.permute.xlu1 %3639 }
 0xb13   :  { %v3638_v43 = vpop.permute.xlu0 %3637 }
 0xb14   :  { %4361 = vmatprep.mubr.msk.f32.mxu1 %vm1001_vm2, %v3638_v43 }
 0xb19   :  { %4362 = vmatmul.mubr.msk.f32.vlgmr.msra.gmra.mrb[24].mxu1 %vm1001_vm2, %v3640_v44 }
 0xbec   :  { %v4363_v48 = vpop.f32.mrb[24].mxu1 }
 0xbed   :  { %v4781_v49 = vadd.f32 %v4363_v48, %v3865_v47  ;;  %v3711_v50 = vpop.f32.mrb[25].mxu1 }
 0xbee   :  { %v4782_v28 = vadd.f32 %v3865_v47, %v3711_v50 }
 0xbef   :  { %v3723_v59 = vadd.f32 %v4781_v49, %v6135_v18 }
 0xbf0   :  { %v3722_v51 = vadd.f32 %v4782_v28, %v6101_v53 }
 0xbf1   :  { %v3727_v52 = vmul.f32 0.1, %v3723_v59  ;;  %vm3725_vm1 = vcmp.gt.f32.partialorder %v3723_v59, 0.0 }
 0xbf2   :  { %vm3724_vm0 = vcmp.gt.f32.partialorder %v3722_v51, 0.0  ;;  %v3726_v54 = vmul.f32 0.1, %v3722_v51 }
 0xbf3   :  { %v3729_v55 = vsel %vm3725_vm1, %v3723_v59, %v3727_v52 }
 0xbf4   :  { %v3728_v57 = vsel %vm3724_vm0, %v3722_v51, %v3726_v54 }
 0xbf5   :  { %4396 = vmatprep.mubr.f32.mxu0 %v3728_v57 }
 0xbf6   :  { %4397 = vmatmul.mubr.f32.vlgmr.msra.gmra.mrb[16].mxu0 %v3729_v55 }
 0xcc9   :  { %v4398_v63 = vpop.f32.mrb[16].mxu0 }
 0xcca   :  { %v3808_v58 = vadd.f32 %v4398_v63, %v3870_v56  ;;  %v3802_v60 = vpop.f32.mrb[17].mxu0 }
 0xccb   :  { %v3803_v61 = vadd.f32 %v3870_v56, %v3802_v60 }
 0xccc   :  { %v3812_v62 = vadd.f32 %v3808_v58, %v6135_v18 }
 0xccd   :  { %v3811_v1 = vadd.f32 %v3803_v61, %v6101_v53 }
 0xcce   :  { %vm3814_vm2 = vcmp.gt.f32.partialorder %v3812_v62, 0.0  ;;  %v3816_v3 = vmul.f32 0.1, %v3812_v62 }
 0xccf   :  { %vm3813_vm3 = vcmp.gt.f32.partialorder %v3811_v1, 0.0  ;;  %v3815_v34 = vmul.f32 0.1, %v3811_v1 }
 0xcd0   :  { %v3818_v5 = vsel %vm3814_vm2, %v3812_v62, %v3816_v3 }
 0xcd1   :  { %3820 = vst [vmem:[%s6273_s24 + $0x8] sm:$0xff] %v3818_v5  ;;  %v3817_v17 = vsel %vm3813_vm3, %v3811_v1, %v3815_v34 }
 0xcd2   :  { %3819 = vst [vmem:[%s6273_s24] sm:$0xff] %v3817_v17 }
 0xcd3   :  { %3825 = vsyncpa [#allocation3], 1 }
 0xcd4   :  { %3826 = vsyncpa [#allocation5], 1 }
 0xcd5   :  { %3827 = vsyncpa [#allocation8], 1 }
 0xcd6   :  { %3828 = vsyncpa [#allocation11], 1 }
 0xcd7   :  { %3829 = vsyncpa [#allocation14], 1 }
 0xcd8   :  { %3830 = vsyncpa [#allocation17], 1 }

</bundles_post_ra>
